<compile_context>
chip_gen: v7x
topology: tpu7x:2x2x1
jax: 0.10.0
libtpu: 0.0.40
codegen_flags: <defaults>
</compile_context>

<pallas_src>
import jax
import jax.numpy as jnp
from jax.experimental import pallas as pl
from jax.experimental.pallas import tpu as pltpu


def _make_encoder_kernel(num_layers: int, hidden_dim: int, seq_len: int, batch: int):
    H, S, B = hidden_dim, seq_len, batch

    def kernel(x_ref, *args):
        # args: w_ih_0, w_hh_0, ..., w_ih_{L-1}, w_hh_{L-1}, bias_all, fc_w, out
        layer_w = args[:2 * num_layers]
        bias_ref = args[2 * num_layers]        # (num_layers + 1, 4H) packed biases
        fc_w_ref = args[2 * num_layers + 1]    # (H, H)
        out_ref = args[2 * num_layers + 2]     # (S*B, H)

        layer_in = x_ref[...]                  # (S*B, in_dim) for layer 0

        for l in range(num_layers):
            w_ih = layer_w[2 * l][...]         # (in, 3H)  gate order (r, z, n)
            w_hh = layer_w[2 * l + 1][...]     # (H, 3H)
            # Packed bias row l: [b_ih_r+b_hh_r | b_ih_z+b_hh_z | b_ih_n | b_hh_n]
            b_gi = bias_ref[l:l + 1, 0:3 * H]                              # (1, 3H)
            # Hoisted broadcast; b_hh_n must stay inside r*(...) (PyTorch semantics).
            b_hn = jnp.broadcast_to(bias_ref[l:l + 1, 3 * H:4 * H], (B, H))

            # Batched input projection for ALL timesteps (not on the serial path).
            gi = jnp.dot(layer_in, w_ih, preferred_element_type=jnp.float32) + b_gi

            # Serial recurrence: one fused hh matmul + gate math per timestep.
            h = jnp.zeros((B, H), jnp.float32)
            h_list = []
            for t in range(S):
                lo = t * B
                gh = jnp.dot(h, w_hh, preferred_element_type=jnp.float32)  # (B, 3H)
                r = jax.nn.sigmoid(gi[lo:lo + B, 0:H] + gh[:, 0:H])
                z = jax.nn.sigmoid(gi[lo:lo + B, H:2 * H] + gh[:, H:2 * H])
                n = jnp.tanh(gi[lo:lo + B, 2 * H:3 * H] + r * (gh[:, 2 * H:3 * H] + b_hn))
                h = (1.0 - z) * n + z * h
                h_list.append(h)

            # Assemble the layer's output sequence once (register/value resident,
            # tile-aligned because B is a multiple of 8).
            layer_in = jnp.concatenate(h_list, axis=0)    # (S*B, H)

        # FC head + sigmoid, batched over all timesteps, single store.
        fc_b = bias_ref[num_layers:num_layers + 1, 0:H]   # (1, H)
        y = jnp.dot(layer_in, fc_w_ref[...], preferred_element_type=jnp.float32) + fc_b
        out_ref[...] = jax.nn.sigmoid(y)

    return kernel


def encoder_forward(x, params, *, num_layers: int, hidden_dim: int):
    """x: (seq_len, batch, z_dim) float32.  Returns (seq_len, batch, hidden_dim)."""
    S, B, Z = x.shape
    H = hidden_dim

    # Pad batch up to a full sublane tile so all serial-path slices/concats align.
    B_pad = ((B + 7) // 8) * 8
    if B_pad != B:
        x = jnp.pad(x, ((0, 0), (0, B_pad - B), (0, 0)))
    x_flat = x.reshape(S * B_pad, Z)

    inputs = [x_flat]
    in_specs = [pl.BlockSpec((S * B_pad, Z), lambda i: (0, 0))]

    def _add(arr):
        inputs.append(arr)
        in_specs.append(pl.BlockSpec(arr.shape, lambda i: (0, 0)))

    # Host-side parameter prep: keep fused (in,3H)/(H,3H) weights, fold r/z
    # bias pairs, pack all biases (plus fc_b) into one lane-aligned array.
    bias_rows = []
    for l in range(num_layers):
        w_ih, w_hh, b_ih, b_hh = params["layers"][l]   # (in,3H), (H,3H), (1,3H), (1,3H)
        _add(w_ih)
        _add(w_hh)
        b_gi = jnp.concatenate(
            [b_ih[:, 0:H] + b_hh[:, 0:H],          # folded reset bias
             b_ih[:, H:2 * H] + b_hh[:, H:2 * H],  # folded update bias
             b_ih[:, 2 * H:3 * H]],                # b_ih_n (b_hh_n stays separate)
            axis=1)                                # (1, 3H)
        bias_rows.append(jnp.concatenate([b_gi, b_hh[:, 2 * H:3 * H]], axis=1))  # (1, 4H)
    # Last bias row carries fc_b in its first H columns.
    bias_rows.append(jnp.concatenate(
        [params["fc_b"], jnp.zeros((1, 3 * H), jnp.float32)], axis=1))
    bias_all = jnp.concatenate(bias_rows, axis=0)   # (num_layers + 1, 4H)
    _add(bias_all)
    _add(params["fc_w"])                            # (H, H)

    kernel = _make_encoder_kernel(num_layers, hidden_dim, S, B_pad)

    out_flat = pl.pallas_call(
        kernel,
        out_shape=jax.ShapeDtypeStruct((S * B_pad, H), jnp.float32),
        grid_spec=pltpu.PrefetchScalarGridSpec(
            num_scalar_prefetch=0,
            grid=(1,),                              # single program: recurrence in-kernel
            in_specs=in_specs,
            out_specs=pl.BlockSpec((S * B_pad, H), lambda i: (0, 0)),
        ),
        compiler_params=pltpu.CompilerParams(
            dimension_semantics=("arbitrary",),
            vmem_limit_bytes=32 * 1024 * 1024,      # explicit budget; fits v7x's 64 MiB
        ),
    )(*inputs)

    out = out_flat.reshape(S, B_pad, H)
    return out[:, :B, :]


def init_params(key, z_dim, hidden_dim, num_layers):
    """Deterministic synthetic parameters with PyTorch GRU/Linear shapes.

    PyTorch stores weight_ih_l{k}: (3H, in), weight_hh_l{k}: (3H, H), biases (3H,)
    with gate order (r, z, n).  We keep the same gate order but pre-transpose the
    weight matrices to (in, 3H) / (H, 3H) for `x @ W` matmuls.
    """
    H = hidden_dim
    bound = 1.0 / jnp.sqrt(jnp.float32(H))
    layers = []
    for l in range(num_layers):
        in_dim = z_dim if l == 0 else H
        key, k1, k2, k3, k4 = jax.random.split(key, 5)
        w_ih = jax.random.uniform(k1, (in_dim, 3 * H), jnp.float32, -bound, bound)
        w_hh = jax.random.uniform(k2, (H, 3 * H), jnp.float32, -bound, bound)
        b_ih = jax.random.uniform(k3, (1, 3 * H), jnp.float32, -bound, bound)
        b_hh = jax.random.uniform(k4, (1, 3 * H), jnp.float32, -bound, bound)
        layers.append((w_ih, w_hh, b_ih, b_hh))
    key, k5, k6 = jax.random.split(key, 3)
    fc_w = jax.random.uniform(k5, (H, H), jnp.float32, -bound, bound)
    fc_b = jax.random.uniform(k6, (1, H), jnp.float32, -bound, bound)
    return {"layers": layers, "fc_w": fc_w, "fc_b": fc_b}


def encoder_reference(x, params, *, num_layers, hidden_dim):
    """Pure-JAX reference (stacked GRU + FC + sigmoid), for validation."""
    H = hidden_dim
    S, B, _ = x.shape
    seq = x
    for l in range(num_layers):
        w_ih, w_hh, b_ih, b_hh = params["layers"][l]

        def step(h, xt):
            gi = xt @ w_ih + b_ih
            gh = h @ w_hh + b_hh
            i_r, i_z, i_n = gi[:, :H], gi[:, H:2 * H], gi[:, 2 * H:]
            h_r, h_z, h_n = gh[:, :H], gh[:, H:2 * H], gh[:, 2 * H:]
            r = jax.nn.sigmoid(i_r + h_r)
            z = jax.nn.sigmoid(i_z + h_z)
            n = jnp.tanh(i_n + r * h_n)
            h_new = (1.0 - z) * n + z * h
            return h_new, h_new

        h0 = jnp.zeros((B, H), jnp.float32)
        _, seq = jax.lax.scan(step, h0, seq)
    y = seq @ params["fc_w"] + params["fc_b"]
    return jax.nn.sigmoid(y)


if __name__ == "__main__":
    # Small shapes consistent with the module: opt.z_dim=8, opt.hidden_dim=32,
    # opt.num_layer=2; seq_len=8, batch=4.
    seq_len, batch, z_dim, hidden_dim, num_layers = 8, 4, 8, 32, 2

    key = jax.random.PRNGKey(0)
    key, kx, kp = jax.random.split(key, 3)
    x = jax.random.normal(kx, (seq_len, batch, z_dim), jnp.float32)
    params = init_params(kp, z_dim, hidden_dim, num_layers)

    out = encoder_forward(x, params, num_layers=num_layers, hidden_dim=hidden_dim)
    out = jax.block_until_ready(out)

    ref = encoder_reference(x, params, num_layers=num_layers, hidden_dim=hidden_dim)
    assert out.shape == (seq_len, batch, hidden_dim)
    assert jnp.allclose(out, ref, atol=1e-4, rtol=1e-4), "mismatch vs JAX reference"

    print("KERNEL_OK")
</pallas_src>

<mosaic_0001>
module attributes {stable_mosaic.version = 11 : i64} {
  func.func @kernel(%arg0: i32, %arg1: memref<64x8xf32, #tpu.memory_space<vmem>>, %arg2: memref<8x96xf32, #tpu.memory_space<vmem>>, %arg3: memref<32x96xf32, #tpu.memory_space<vmem>>, %arg4: memref<32x96xf32, #tpu.memory_space<vmem>>, %arg5: memref<32x96xf32, #tpu.memory_space<vmem>>, %arg6: memref<3x128xf32, #tpu.memory_space<vmem>>, %arg7: memref<32x32xf32, #tpu.memory_space<vmem>>, %arg8: memref<64x32xf32, #tpu.memory_space<vmem>>) attributes {dimension_semantics = [#tpu.dimension_semantics<arbitrary>], iteration_bounds = array<i64: 1>, scalar_prefetch = 0 : i64, scratch_operands = 0 : i64, tpu.core_type = #tpu.core_type<tc>, window_params = [{pipeline_mode = #tpu.pipeline_mode<synchronous>, transform_indices = @transform_0, window_bounds = array<i64: 64, 8>}, {pipeline_mode = #tpu.pipeline_mode<synchronous>, transform_indices = @transform_1, window_bounds = array<i64: 8, 96>}, {pipeline_mode = #tpu.pipeline_mode<synchronous>, transform_indices = @transform_2, window_bounds = array<i64: 32, 96>}, {pipeline_mode = #tpu.pipeline_mode<synchronous>, transform_indices = @transform_3, window_bounds = array<i64: 32, 96>}, {pipeline_mode = #tpu.pipeline_mode<synchronous>, transform_indices = @transform_4, window_bounds = array<i64: 32, 96>}, {pipeline_mode = #tpu.pipeline_mode<synchronous>, transform_indices = @transform_5, window_bounds = array<i64: 3, 128>}, {pipeline_mode = #tpu.pipeline_mode<synchronous>, transform_indices = @transform_6, window_bounds = array<i64: 32, 32>}, {pipeline_mode = #tpu.pipeline_mode<synchronous>, transform_indices = @transform_7, window_bounds = array<i64: 64, 32>}]} {
    %c0 = arith.constant 0 : index
    %c0_0 = arith.constant 0 : index
    %0 = vector.load %arg1[%c0, %c0_0] : memref<64x8xf32, #tpu.memory_space<vmem>>, vector<64x8xf32>
    %c0_1 = arith.constant 0 : index
    %c0_2 = arith.constant 0 : index
    %1 = vector.load %arg2[%c0_1, %c0_2] : memref<8x96xf32, #tpu.memory_space<vmem>>, vector<8x96xf32>
    %c0_3 = arith.constant 0 : index
    %c0_4 = arith.constant 0 : index
    %2 = vector.load %arg3[%c0_3, %c0_4] : memref<32x96xf32, #tpu.memory_space<vmem>>, vector<32x96xf32>
    %c0_5 = arith.constant 0 : index
    %c0_6 = arith.constant 0 : index
    %3 = vector.load %arg6[%c0_5, %c0_6] : memref<3x128xf32, #tpu.memory_space<vmem>>, vector<1x96xf32>
    %c0_7 = arith.constant 0 : index
    %c96 = arith.constant 96 : index
    %4 = vector.load %arg6[%c0_7, %c96] : memref<3x128xf32, #tpu.memory_space<vmem>>, vector<1x32xf32>
    %5 = vector.shape_cast %4 : vector<1x32xf32> to vector<1x32xf32>
    %6 = vector.broadcast %5 : vector<1x32xf32> to vector<8x32xf32>
    %cst = arith.constant dense<0.000000e+00> : vector<64x96xf32>
    %7 = tpu.matmul %0, %1, %cst {dimension_numbers = #tpu.dot_dimension_numbers<[1], [0], [0], [1], [0, 0, 1, 1], [], []>} : vector<64x8xf32>, vector<8x96xf32>, vector<64x96xf32> -> vector<64x96xf32>
    %8 = vector.broadcast %3 : vector<1x96xf32> to vector<64x96xf32>
    %9 = arith.addf %7, %8 : vector<64x96xf32>
    %cst_8 = arith.constant 0.000000e+00 : f32
    %10 = vector.broadcast %cst_8 : f32 to vector<8x32xf32>
    %cst_9 = arith.constant dense<0.000000e+00> : vector<8x96xf32>
    %11 = tpu.matmul %10, %2, %cst_9 {dimension_numbers = #tpu.dot_dimension_numbers<[1], [0], [0], [1], [0, 0, 1, 1], [], []>} : vector<8x32xf32>, vector<32x96xf32>, vector<8x96xf32> -> vector<8x96xf32>
    %12 = vector.extract_strided_slice %9 {offsets = [0, 0], sizes = [8, 32], strides = [1, 1]} : vector<64x96xf32> to vector<8x32xf32>
    %13 = vector.extract_strided_slice %11 {offsets = [0, 0], sizes = [8, 32], strides = [1, 1]} : vector<8x96xf32> to vector<8x32xf32>
    %14 = arith.addf %12, %13 : vector<8x32xf32>
    %15 = arith.negf %14 : vector<8x32xf32>
    %16 = math.exp %15 : vector<8x32xf32>
    %cst_10 = arith.constant 1.000000e+00 : f32
    %17 = vector.broadcast %cst_10 : f32 to vector<8x32xf32>
    %18 = arith.addf %17, %16 : vector<8x32xf32>
    %19 = arith.divf %17, %18 : vector<8x32xf32>
    %20 = vector.extract_strided_slice %9 {offsets = [0, 32], sizes = [8, 32], strides = [1, 1]} : vector<64x96xf32> to vector<8x32xf32>
    %21 = vector.extract_strided_slice %11 {offsets = [0, 32], sizes = [8, 32], strides = [1, 1]} : vector<8x96xf32> to vector<8x32xf32>
    %22 = arith.addf %20, %21 : vector<8x32xf32>
    %23 = arith.negf %22 : vector<8x32xf32>
    %24 = math.exp %23 : vector<8x32xf32>
    %cst_11 = arith.constant 1.000000e+00 : f32
    %25 = vector.broadcast %cst_11 : f32 to vector<8x32xf32>
    %26 = arith.addf %25, %24 : vector<8x32xf32>
    %27 = arith.divf %25, %26 : vector<8x32xf32>
    %28 = vector.extract_strided_slice %9 {offsets = [0, 64], sizes = [8, 32], strides = [1, 1]} : vector<64x96xf32> to vector<8x32xf32>
    %29 = vector.extract_strided_slice %11 {offsets = [0, 64], sizes = [8, 32], strides = [1, 1]} : vector<8x96xf32> to vector<8x32xf32>
    %30 = arith.addf %29, %6 : vector<8x32xf32>
    %31 = arith.mulf %19, %30 : vector<8x32xf32>
    %32 = arith.addf %28, %31 : vector<8x32xf32>
    %33 = math.tanh %32 : vector<8x32xf32>
    %cst_12 = arith.constant 1.000000e+00 : f32
    %34 = vector.broadcast %cst_12 : f32 to vector<8x32xf32>
    %35 = arith.subf %34, %27 : vector<8x32xf32>
    %36 = arith.mulf %35, %33 : vector<8x32xf32>
    %37 = arith.mulf %27, %10 : vector<8x32xf32>
    %38 = arith.addf %36, %37 : vector<8x32xf32>
    %cst_13 = arith.constant dense<0.000000e+00> : vector<8x96xf32>
    %39 = tpu.matmul %38, %2, %cst_13 {dimension_numbers = #tpu.dot_dimension_numbers<[1], [0], [0], [1], [0, 0, 1, 1], [], []>} : vector<8x32xf32>, vector<32x96xf32>, vector<8x96xf32> -> vector<8x96xf32>
    %40 = vector.extract_strided_slice %9 {offsets = [8, 0], sizes = [8, 32], strides = [1, 1]} : vector<64x96xf32> to vector<8x32xf32>
    %41 = vector.extract_strided_slice %39 {offsets = [0, 0], sizes = [8, 32], strides = [1, 1]} : vector<8x96xf32> to vector<8x32xf32>
    %42 = arith.addf %40, %41 : vector<8x32xf32>
    %43 = arith.negf %42 : vector<8x32xf32>
    %44 = math.exp %43 : vector<8x32xf32>
    %cst_14 = arith.constant 1.000000e+00 : f32
    %45 = vector.broadcast %cst_14 : f32 to vector<8x32xf32>
    %46 = arith.addf %45, %44 : vector<8x32xf32>
    %47 = arith.divf %45, %46 : vector<8x32xf32>
    %48 = vector.extract_strided_slice %9 {offsets = [8, 32], sizes = [8, 32], strides = [1, 1]} : vector<64x96xf32> to vector<8x32xf32>
    %49 = vector.extract_strided_slice %39 {offsets = [0, 32], sizes = [8, 32], strides = [1, 1]} : vector<8x96xf32> to vector<8x32xf32>
    %50 = arith.addf %48, %49 : vector<8x32xf32>
    %51 = arith.negf %50 : vector<8x32xf32>
    %52 = math.exp %51 : vector<8x32xf32>
    %cst_15 = arith.constant 1.000000e+00 : f32
    %53 = vector.broadcast %cst_15 : f32 to vector<8x32xf32>
    %54 = arith.addf %53, %52 : vector<8x32xf32>
    %55 = arith.divf %53, %54 : vector<8x32xf32>
    %56 = vector.extract_strided_slice %9 {offsets = [8, 64], sizes = [8, 32], strides = [1, 1]} : vector<64x96xf32> to vector<8x32xf32>
    %57 = vector.extract_strided_slice %39 {offsets = [0, 64], sizes = [8, 32], strides = [1, 1]} : vector<8x96xf32> to vector<8x32xf32>
    %58 = arith.addf %57, %6 : vector<8x32xf32>
    %59 = arith.mulf %47, %58 : vector<8x32xf32>
    %60 = arith.addf %56, %59 : vector<8x32xf32>
    %61 = math.tanh %60 : vector<8x32xf32>
    %cst_16 = arith.constant 1.000000e+00 : f32
    %62 = vector.broadcast %cst_16 : f32 to vector<8x32xf32>
    %63 = arith.subf %62, %55 : vector<8x32xf32>
    %64 = arith.mulf %63, %61 : vector<8x32xf32>
    %65 = arith.mulf %55, %38 : vector<8x32xf32>
    %66 = arith.addf %64, %65 : vector<8x32xf32>
    %cst_17 = arith.constant dense<0.000000e+00> : vector<8x96xf32>
    %67 = tpu.matmul %66, %2, %cst_17 {dimension_numbers = #tpu.dot_dimension_numbers<[1], [0], [0], [1], [0, 0, 1, 1], [], []>} : vector<8x32xf32>, vector<32x96xf32>, vector<8x96xf32> -> vector<8x96xf32>
    %68 = vector.extract_strided_slice %9 {offsets = [16, 0], sizes = [8, 32], strides = [1, 1]} : vector<64x96xf32> to vector<8x32xf32>
    %69 = vector.extract_strided_slice %67 {offsets = [0, 0], sizes = [8, 32], strides = [1, 1]} : vector<8x96xf32> to vector<8x32xf32>
    %70 = arith.addf %68, %69 : vector<8x32xf32>
    %71 = arith.negf %70 : vector<8x32xf32>
    %72 = math.exp %71 : vector<8x32xf32>
    %cst_18 = arith.constant 1.000000e+00 : f32
    %73 = vector.broadcast %cst_18 : f32 to vector<8x32xf32>
    %74 = arith.addf %73, %72 : vector<8x32xf32>
    %75 = arith.divf %73, %74 : vector<8x32xf32>
    %76 = vector.extract_strided_slice %9 {offsets = [16, 32], sizes = [8, 32], strides = [1, 1]} : vector<64x96xf32> to vector<8x32xf32>
    %77 = vector.extract_strided_slice %67 {offsets = [0, 32], sizes = [8, 32], strides = [1, 1]} : vector<8x96xf32> to vector<8x32xf32>
    %78 = arith.addf %76, %77 : vector<8x32xf32>
    %79 = arith.negf %78 : vector<8x32xf32>
    %80 = math.exp %79 : vector<8x32xf32>
    %cst_19 = arith.constant 1.000000e+00 : f32
    %81 = vector.broadcast %cst_19 : f32 to vector<8x32xf32>
    %82 = arith.addf %81, %80 : vector<8x32xf32>
    %83 = arith.divf %81, %82 : vector<8x32xf32>
    %84 = vector.extract_strided_slice %9 {offsets = [16, 64], sizes = [8, 32], strides = [1, 1]} : vector<64x96xf32> to vector<8x32xf32>
    %85 = vector.extract_strided_slice %67 {offsets = [0, 64], sizes = [8, 32], strides = [1, 1]} : vector<8x96xf32> to vector<8x32xf32>
    %86 = arith.addf %85, %6 : vector<8x32xf32>
    %87 = arith.mulf %75, %86 : vector<8x32xf32>
    %88 = arith.addf %84, %87 : vector<8x32xf32>
    %89 = math.tanh %88 : vector<8x32xf32>
    %cst_20 = arith.constant 1.000000e+00 : f32
    %90 = vector.broadcast %cst_20 : f32 to vector<8x32xf32>
    %91 = arith.subf %90, %83 : vector<8x32xf32>
    %92 = arith.mulf %91, %89 : vector<8x32xf32>
    %93 = arith.mulf %83, %66 : vector<8x32xf32>
    %94 = arith.addf %92, %93 : vector<8x32xf32>
    %cst_21 = arith.constant dense<0.000000e+00> : vector<8x96xf32>
    %95 = tpu.matmul %94, %2, %cst_21 {dimension_numbers = #tpu.dot_dimension_numbers<[1], [0], [0], [1], [0, 0, 1, 1], [], []>} : vector<8x32xf32>, vector<32x96xf32>, vector<8x96xf32> -> vector<8x96xf32>
    %96 = vector.extract_strided_slice %9 {offsets = [24, 0], sizes = [8, 32], strides = [1, 1]} : vector<64x96xf32> to vector<8x32xf32>
    %97 = vector.extract_strided_slice %95 {offsets = [0, 0], sizes = [8, 32], strides = [1, 1]} : vector<8x96xf32> to vector<8x32xf32>
    %98 = arith.addf %96, %97 : vector<8x32xf32>
    %99 = arith.negf %98 : vector<8x32xf32>
    %100 = math.exp %99 : vector<8x32xf32>
    %cst_22 = arith.constant 1.000000e+00 : f32
    %101 = vector.broadcast %cst_22 : f32 to vector<8x32xf32>
    %102 = arith.addf %101, %100 : vector<8x32xf32>
    %103 = arith.divf %101, %102 : vector<8x32xf32>
    %104 = vector.extract_strided_slice %9 {offsets = [24, 32], sizes = [8, 32], strides = [1, 1]} : vector<64x96xf32> to vector<8x32xf32>
    %105 = vector.extract_strided_slice %95 {offsets = [0, 32], sizes = [8, 32], strides = [1, 1]} : vector<8x96xf32> to vector<8x32xf32>
    %106 = arith.addf %104, %105 : vector<8x32xf32>
    %107 = arith.negf %106 : vector<8x32xf32>
    %108 = math.exp %107 : vector<8x32xf32>
    %cst_23 = arith.constant 1.000000e+00 : f32
    %109 = vector.broadcast %cst_23 : f32 to vector<8x32xf32>
    %110 = arith.addf %109, %108 : vector<8x32xf32>
    %111 = arith.divf %109, %110 : vector<8x32xf32>
    %112 = vector.extract_strided_slice %9 {offsets = [24, 64], sizes = [8, 32], strides = [1, 1]} : vector<64x96xf32> to vector<8x32xf32>
    %113 = vector.extract_strided_slice %95 {offsets = [0, 64], sizes = [8, 32], strides = [1, 1]} : vector<8x96xf32> to vector<8x32xf32>
    %114 = arith.addf %113, %6 : vector<8x32xf32>
    %115 = arith.mulf %103, %114 : vector<8x32xf32>
    %116 = arith.addf %112, %115 : vector<8x32xf32>
    %117 = math.tanh %116 : vector<8x32xf32>
    %cst_24 = arith.constant 1.000000e+00 : f32
    %118 = vector.broadcast %cst_24 : f32 to vector<8x32xf32>
    %119 = arith.subf %118, %111 : vector<8x32xf32>
    %120 = arith.mulf %119, %117 : vector<8x32xf32>
    %121 = arith.mulf %111, %94 : vector<8x32xf32>
    %122 = arith.addf %120, %121 : vector<8x32xf32>
    %cst_25 = arith.constant dense<0.000000e+00> : vector<8x96xf32>
    %123 = tpu.matmul %122, %2, %cst_25 {dimension_numbers = #tpu.dot_dimension_numbers<[1], [0], [0], [1], [0, 0, 1, 1], [], []>} : vector<8x32xf32>, vector<32x96xf32>, vector<8x96xf32> -> vector<8x96xf32>
    %124 = vector.extract_strided_slice %9 {offsets = [32, 0], sizes = [8, 32], strides = [1, 1]} : vector<64x96xf32> to vector<8x32xf32>
    %125 = vector.extract_strided_slice %123 {offsets = [0, 0], sizes = [8, 32], strides = [1, 1]} : vector<8x96xf32> to vector<8x32xf32>
    %126 = arith.addf %124, %125 : vector<8x32xf32>
    %127 = arith.negf %126 : vector<8x32xf32>
    %128 = math.exp %127 : vector<8x32xf32>
    %cst_26 = arith.constant 1.000000e+00 : f32
    %129 = vector.broadcast %cst_26 : f32 to vector<8x32xf32>
    %130 = arith.addf %129, %128 : vector<8x32xf32>
    %131 = arith.divf %129, %130 : vector<8x32xf32>
    %132 = vector.extract_strided_slice %9 {offsets = [32, 32], sizes = [8, 32], strides = [1, 1]} : vector<64x96xf32> to vector<8x32xf32>
    %133 = vector.extract_strided_slice %123 {offsets = [0, 32], sizes = [8, 32], strides = [1, 1]} : vector<8x96xf32> to vector<8x32xf32>
    %134 = arith.addf %132, %133 : vector<8x32xf32>
    %135 = arith.negf %134 : vector<8x32xf32>
    %136 = math.exp %135 : vector<8x32xf32>
    %cst_27 = arith.constant 1.000000e+00 : f32
    %137 = vector.broadcast %cst_27 : f32 to vector<8x32xf32>
    %138 = arith.addf %137, %136 : vector<8x32xf32>
    %139 = arith.divf %137, %138 : vector<8x32xf32>
    %140 = vector.extract_strided_slice %9 {offsets = [32, 64], sizes = [8, 32], strides = [1, 1]} : vector<64x96xf32> to vector<8x32xf32>
    %141 = vector.extract_strided_slice %123 {offsets = [0, 64], sizes = [8, 32], strides = [1, 1]} : vector<8x96xf32> to vector<8x32xf32>
    %142 = arith.addf %141, %6 : vector<8x32xf32>
    %143 = arith.mulf %131, %142 : vector<8x32xf32>
    %144 = arith.addf %140, %143 : vector<8x32xf32>
    %145 = math.tanh %144 : vector<8x32xf32>
    %cst_28 = arith.constant 1.000000e+00 : f32
    %146 = vector.broadcast %cst_28 : f32 to vector<8x32xf32>
    %147 = arith.subf %146, %139 : vector<8x32xf32>
    %148 = arith.mulf %147, %145 : vector<8x32xf32>
    %149 = arith.mulf %139, %122 : vector<8x32xf32>
    %150 = arith.addf %148, %149 : vector<8x32xf32>
    %cst_29 = arith.constant dense<0.000000e+00> : vector<8x96xf32>
    %151 = tpu.matmul %150, %2, %cst_29 {dimension_numbers = #tpu.dot_dimension_numbers<[1], [0], [0], [1], [0, 0, 1, 1], [], []>} : vector<8x32xf32>, vector<32x96xf32>, vector<8x96xf32> -> vector<8x96xf32>
    %152 = vector.extract_strided_slice %9 {offsets = [40, 0], sizes = [8, 32], strides = [1, 1]} : vector<64x96xf32> to vector<8x32xf32>
    %153 = vector.extract_strided_slice %151 {offsets = [0, 0], sizes = [8, 32], strides = [1, 1]} : vector<8x96xf32> to vector<8x32xf32>
    %154 = arith.addf %152, %153 : vector<8x32xf32>
    %155 = arith.negf %154 : vector<8x32xf32>
    %156 = math.exp %155 : vector<8x32xf32>
    %cst_30 = arith.constant 1.000000e+00 : f32
    %157 = vector.broadcast %cst_30 : f32 to vector<8x32xf32>
    %158 = arith.addf %157, %156 : vector<8x32xf32>
    %159 = arith.divf %157, %158 : vector<8x32xf32>
    %160 = vector.extract_strided_slice %9 {offsets = [40, 32], sizes = [8, 32], strides = [1, 1]} : vector<64x96xf32> to vector<8x32xf32>
    %161 = vector.extract_strided_slice %151 {offsets = [0, 32], sizes = [8, 32], strides = [1, 1]} : vector<8x96xf32> to vector<8x32xf32>
    %162 = arith.addf %160, %161 : vector<8x32xf32>
    %163 = arith.negf %162 : vector<8x32xf32>
    %164 = math.exp %163 : vector<8x32xf32>
    %cst_31 = arith.constant 1.000000e+00 : f32
    %165 = vector.broadcast %cst_31 : f32 to vector<8x32xf32>
    %166 = arith.addf %165, %164 : vector<8x32xf32>
    %167 = arith.divf %165, %166 : vector<8x32xf32>
    %168 = vector.extract_strided_slice %9 {offsets = [40, 64], sizes = [8, 32], strides = [1, 1]} : vector<64x96xf32> to vector<8x32xf32>
    %169 = vector.extract_strided_slice %151 {offsets = [0, 64], sizes = [8, 32], strides = [1, 1]} : vector<8x96xf32> to vector<8x32xf32>
    %170 = arith.addf %169, %6 : vector<8x32xf32>
    %171 = arith.mulf %159, %170 : vector<8x32xf32>
    %172 = arith.addf %168, %171 : vector<8x32xf32>
    %173 = math.tanh %172 : vector<8x32xf32>
    %cst_32 = arith.constant 1.000000e+00 : f32
    %174 = vector.broadcast %cst_32 : f32 to vector<8x32xf32>
    %175 = arith.subf %174, %167 : vector<8x32xf32>
    %176 = arith.mulf %175, %173 : vector<8x32xf32>
    %177 = arith.mulf %167, %150 : vector<8x32xf32>
    %178 = arith.addf %176, %177 : vector<8x32xf32>
    %cst_33 = arith.constant dense<0.000000e+00> : vector<8x96xf32>
    %179 = tpu.matmul %178, %2, %cst_33 {dimension_numbers = #tpu.dot_dimension_numbers<[1], [0], [0], [1], [0, 0, 1, 1], [], []>} : vector<8x32xf32>, vector<32x96xf32>, vector<8x96xf32> -> vector<8x96xf32>
    %180 = vector.extract_strided_slice %9 {offsets = [48, 0], sizes = [8, 32], strides = [1, 1]} : vector<64x96xf32> to vector<8x32xf32>
    %181 = vector.extract_strided_slice %179 {offsets = [0, 0], sizes = [8, 32], strides = [1, 1]} : vector<8x96xf32> to vector<8x32xf32>
    %182 = arith.addf %180, %181 : vector<8x32xf32>
    %183 = arith.negf %182 : vector<8x32xf32>
    %184 = math.exp %183 : vector<8x32xf32>
    %cst_34 = arith.constant 1.000000e+00 : f32
    %185 = vector.broadcast %cst_34 : f32 to vector<8x32xf32>
    %186 = arith.addf %185, %184 : vector<8x32xf32>
    %187 = arith.divf %185, %186 : vector<8x32xf32>
    %188 = vector.extract_strided_slice %9 {offsets = [48, 32], sizes = [8, 32], strides = [1, 1]} : vector<64x96xf32> to vector<8x32xf32>
    %189 = vector.extract_strided_slice %179 {offsets = [0, 32], sizes = [8, 32], strides = [1, 1]} : vector<8x96xf32> to vector<8x32xf32>
    %190 = arith.addf %188, %189 : vector<8x32xf32>
    %191 = arith.negf %190 : vector<8x32xf32>
    %192 = math.exp %191 : vector<8x32xf32>
    %cst_35 = arith.constant 1.000000e+00 : f32
    %193 = vector.broadcast %cst_35 : f32 to vector<8x32xf32>
    %194 = arith.addf %193, %192 : vector<8x32xf32>
    %195 = arith.divf %193, %194 : vector<8x32xf32>
    %196 = vector.extract_strided_slice %9 {offsets = [48, 64], sizes = [8, 32], strides = [1, 1]} : vector<64x96xf32> to vector<8x32xf32>
    %197 = vector.extract_strided_slice %179 {offsets = [0, 64], sizes = [8, 32], strides = [1, 1]} : vector<8x96xf32> to vector<8x32xf32>
    %198 = arith.addf %197, %6 : vector<8x32xf32>
    %199 = arith.mulf %187, %198 : vector<8x32xf32>
    %200 = arith.addf %196, %199 : vector<8x32xf32>
    %201 = math.tanh %200 : vector<8x32xf32>
    %cst_36 = arith.constant 1.000000e+00 : f32
    %202 = vector.broadcast %cst_36 : f32 to vector<8x32xf32>
    %203 = arith.subf %202, %195 : vector<8x32xf32>
    %204 = arith.mulf %203, %201 : vector<8x32xf32>
    %205 = arith.mulf %195, %178 : vector<8x32xf32>
    %206 = arith.addf %204, %205 : vector<8x32xf32>
    %cst_37 = arith.constant dense<0.000000e+00> : vector<8x96xf32>
    %207 = tpu.matmul %206, %2, %cst_37 {dimension_numbers = #tpu.dot_dimension_numbers<[1], [0], [0], [1], [0, 0, 1, 1], [], []>} : vector<8x32xf32>, vector<32x96xf32>, vector<8x96xf32> -> vector<8x96xf32>
    %208 = vector.extract_strided_slice %9 {offsets = [56, 0], sizes = [8, 32], strides = [1, 1]} : vector<64x96xf32> to vector<8x32xf32>
    %209 = vector.extract_strided_slice %207 {offsets = [0, 0], sizes = [8, 32], strides = [1, 1]} : vector<8x96xf32> to vector<8x32xf32>
    %210 = arith.addf %208, %209 : vector<8x32xf32>
    %211 = arith.negf %210 : vector<8x32xf32>
    %212 = math.exp %211 : vector<8x32xf32>
    %cst_38 = arith.constant 1.000000e+00 : f32
    %213 = vector.broadcast %cst_38 : f32 to vector<8x32xf32>
    %214 = arith.addf %213, %212 : vector<8x32xf32>
    %215 = arith.divf %213, %214 : vector<8x32xf32>
    %216 = vector.extract_strided_slice %9 {offsets = [56, 32], sizes = [8, 32], strides = [1, 1]} : vector<64x96xf32> to vector<8x32xf32>
    %217 = vector.extract_strided_slice %207 {offsets = [0, 32], sizes = [8, 32], strides = [1, 1]} : vector<8x96xf32> to vector<8x32xf32>
    %218 = arith.addf %216, %217 : vector<8x32xf32>
    %219 = arith.negf %218 : vector<8x32xf32>
    %220 = math.exp %219 : vector<8x32xf32>
    %cst_39 = arith.constant 1.000000e+00 : f32
    %221 = vector.broadcast %cst_39 : f32 to vector<8x32xf32>
    %222 = arith.addf %221, %220 : vector<8x32xf32>
    %223 = arith.divf %221, %222 : vector<8x32xf32>
    %224 = vector.extract_strided_slice %9 {offsets = [56, 64], sizes = [8, 32], strides = [1, 1]} : vector<64x96xf32> to vector<8x32xf32>
    %225 = vector.extract_strided_slice %207 {offsets = [0, 64], sizes = [8, 32], strides = [1, 1]} : vector<8x96xf32> to vector<8x32xf32>
    %226 = arith.addf %225, %6 : vector<8x32xf32>
    %227 = arith.mulf %215, %226 : vector<8x32xf32>
    %228 = arith.addf %224, %227 : vector<8x32xf32>
    %229 = math.tanh %228 : vector<8x32xf32>
    %cst_40 = arith.constant 1.000000e+00 : f32
    %230 = vector.broadcast %cst_40 : f32 to vector<8x32xf32>
    %231 = arith.subf %230, %223 : vector<8x32xf32>
    %232 = arith.mulf %231, %229 : vector<8x32xf32>
    %233 = arith.mulf %223, %206 : vector<8x32xf32>
    %234 = arith.addf %232, %233 : vector<8x32xf32>
    %235 = tpu.concatenate %38, %66, %94, %122, %150, %178, %206, %234 in 0 : vector<8x32xf32>, vector<8x32xf32>, vector<8x32xf32>, vector<8x32xf32>, vector<8x32xf32>, vector<8x32xf32>, vector<8x32xf32>, vector<8x32xf32> -> vector<64x32xf32>
    %c0_41 = arith.constant 0 : index
    %c0_42 = arith.constant 0 : index
    %236 = vector.load %arg4[%c0_41, %c0_42] : memref<32x96xf32, #tpu.memory_space<vmem>>, vector<32x96xf32>
    %c0_43 = arith.constant 0 : index
    %c0_44 = arith.constant 0 : index
    %237 = vector.load %arg5[%c0_43, %c0_44] : memref<32x96xf32, #tpu.memory_space<vmem>>, vector<32x96xf32>
    %c1 = arith.constant 1 : index
    %c0_45 = arith.constant 0 : index
    %238 = vector.load %arg6[%c1, %c0_45] : memref<3x128xf32, #tpu.memory_space<vmem>>, vector<1x96xf32>
    %c1_46 = arith.constant 1 : index
    %c96_47 = arith.constant 96 : index
    %239 = vector.load %arg6[%c1_46, %c96_47] : memref<3x128xf32, #tpu.memory_space<vmem>>, vector<1x32xf32>
    %240 = vector.shape_cast %239 : vector<1x32xf32> to vector<1x32xf32>
    %241 = vector.broadcast %240 : vector<1x32xf32> to vector<8x32xf32>
    %cst_48 = arith.constant dense<0.000000e+00> : vector<64x96xf32>
    %242 = tpu.matmul %235, %236, %cst_48 {dimension_numbers = #tpu.dot_dimension_numbers<[1], [0], [0], [1], [0, 0, 1, 1], [], []>} : vector<64x32xf32>, vector<32x96xf32>, vector<64x96xf32> -> vector<64x96xf32>
    %243 = vector.broadcast %238 : vector<1x96xf32> to vector<64x96xf32>
    %244 = arith.addf %242, %243 : vector<64x96xf32>
    %cst_49 = arith.constant 0.000000e+00 : f32
    %245 = vector.broadcast %cst_49 : f32 to vector<8x32xf32>
    %cst_50 = arith.constant dense<0.000000e+00> : vector<8x96xf32>
    %246 = tpu.matmul %245, %237, %cst_50 {dimension_numbers = #tpu.dot_dimension_numbers<[1], [0], [0], [1], [0, 0, 1, 1], [], []>} : vector<8x32xf32>, vector<32x96xf32>, vector<8x96xf32> -> vector<8x96xf32>
    %247 = vector.extract_strided_slice %244 {offsets = [0, 0], sizes = [8, 32], strides = [1, 1]} : vector<64x96xf32> to vector<8x32xf32>
    %248 = vector.extract_strided_slice %246 {offsets = [0, 0], sizes = [8, 32], strides = [1, 1]} : vector<8x96xf32> to vector<8x32xf32>
    %249 = arith.addf %247, %248 : vector<8x32xf32>
    %250 = arith.negf %249 : vector<8x32xf32>
    %251 = math.exp %250 : vector<8x32xf32>
    %cst_51 = arith.constant 1.000000e+00 : f32
    %252 = vector.broadcast %cst_51 : f32 to vector<8x32xf32>
    %253 = arith.addf %252, %251 : vector<8x32xf32>
    %254 = arith.divf %252, %253 : vector<8x32xf32>
    %255 = vector.extract_strided_slice %244 {offsets = [0, 32], sizes = [8, 32], strides = [1, 1]} : vector<64x96xf32> to vector<8x32xf32>
    %256 = vector.extract_strided_slice %246 {offsets = [0, 32], sizes = [8, 32], strides = [1, 1]} : vector<8x96xf32> to vector<8x32xf32>
    %257 = arith.addf %255, %256 : vector<8x32xf32>
    %258 = arith.negf %257 : vector<8x32xf32>
    %259 = math.exp %258 : vector<8x32xf32>
    %cst_52 = arith.constant 1.000000e+00 : f32
    %260 = vector.broadcast %cst_52 : f32 to vector<8x32xf32>
    %261 = arith.addf %260, %259 : vector<8x32xf32>
    %262 = arith.divf %260, %261 : vector<8x32xf32>
    %263 = vector.extract_strided_slice %244 {offsets = [0, 64], sizes = [8, 32], strides = [1, 1]} : vector<64x96xf32> to vector<8x32xf32>
    %264 = vector.extract_strided_slice %246 {offsets = [0, 64], sizes = [8, 32], strides = [1, 1]} : vector<8x96xf32> to vector<8x32xf32>
    %265 = arith.addf %264, %241 : vector<8x32xf32>
    %266 = arith.mulf %254, %265 : vector<8x32xf32>
    %267 = arith.addf %263, %266 : vector<8x32xf32>
    %268 = math.tanh %267 : vector<8x32xf32>
    %cst_53 = arith.constant 1.000000e+00 : f32
    %269 = vector.broadcast %cst_53 : f32 to vector<8x32xf32>
    %270 = arith.subf %269, %262 : vector<8x32xf32>
    %271 = arith.mulf %270, %268 : vector<8x32xf32>
    %272 = arith.mulf %262, %245 : vector<8x32xf32>
    %273 = arith.addf %271, %272 : vector<8x32xf32>
    %cst_54 = arith.constant dense<0.000000e+00> : vector<8x96xf32>
    %274 = tpu.matmul %273, %237, %cst_54 {dimension_numbers = #tpu.dot_dimension_numbers<[1], [0], [0], [1], [0, 0, 1, 1], [], []>} : vector<8x32xf32>, vector<32x96xf32>, vector<8x96xf32> -> vector<8x96xf32>
    %275 = vector.extract_strided_slice %244 {offsets = [8, 0], sizes = [8, 32], strides = [1, 1]} : vector<64x96xf32> to vector<8x32xf32>
    %276 = vector.extract_strided_slice %274 {offsets = [0, 0], sizes = [8, 32], strides = [1, 1]} : vector<8x96xf32> to vector<8x32xf32>
    %277 = arith.addf %275, %276 : vector<8x32xf32>
    %278 = arith.negf %277 : vector<8x32xf32>
    %279 = math.exp %278 : vector<8x32xf32>
    %cst_55 = arith.constant 1.000000e+00 : f32
    %280 = vector.broadcast %cst_55 : f32 to vector<8x32xf32>
    %281 = arith.addf %280, %279 : vector<8x32xf32>
    %282 = arith.divf %280, %281 : vector<8x32xf32>
    %283 = vector.extract_strided_slice %244 {offsets = [8, 32], sizes = [8, 32], strides = [1, 1]} : vector<64x96xf32> to vector<8x32xf32>
    %284 = vector.extract_strided_slice %274 {offsets = [0, 32], sizes = [8, 32], strides = [1, 1]} : vector<8x96xf32> to vector<8x32xf32>
    %285 = arith.addf %283, %284 : vector<8x32xf32>
    %286 = arith.negf %285 : vector<8x32xf32>
    %287 = math.exp %286 : vector<8x32xf32>
    %cst_56 = arith.constant 1.000000e+00 : f32
    %288 = vector.broadcast %cst_56 : f32 to vector<8x32xf32>
    %289 = arith.addf %288, %287 : vector<8x32xf32>
    %290 = arith.divf %288, %289 : vector<8x32xf32>
    %291 = vector.extract_strided_slice %244 {offsets = [8, 64], sizes = [8, 32], strides = [1, 1]} : vector<64x96xf32> to vector<8x32xf32>
    %292 = vector.extract_strided_slice %274 {offsets = [0, 64], sizes = [8, 32], strides = [1, 1]} : vector<8x96xf32> to vector<8x32xf32>
    %293 = arith.addf %292, %241 : vector<8x32xf32>
    %294 = arith.mulf %282, %293 : vector<8x32xf32>
    %295 = arith.addf %291, %294 : vector<8x32xf32>
    %296 = math.tanh %295 : vector<8x32xf32>
    %cst_57 = arith.constant 1.000000e+00 : f32
    %297 = vector.broadcast %cst_57 : f32 to vector<8x32xf32>
    %298 = arith.subf %297, %290 : vector<8x32xf32>
    %299 = arith.mulf %298, %296 : vector<8x32xf32>
    %300 = arith.mulf %290, %273 : vector<8x32xf32>
    %301 = arith.addf %299, %300 : vector<8x32xf32>
    %cst_58 = arith.constant dense<0.000000e+00> : vector<8x96xf32>
    %302 = tpu.matmul %301, %237, %cst_58 {dimension_numbers = #tpu.dot_dimension_numbers<[1], [0], [0], [1], [0, 0, 1, 1], [], []>} : vector<8x32xf32>, vector<32x96xf32>, vector<8x96xf32> -> vector<8x96xf32>
    %303 = vector.extract_strided_slice %244 {offsets = [16, 0], sizes = [8, 32], strides = [1, 1]} : vector<64x96xf32> to vector<8x32xf32>
    %304 = vector.extract_strided_slice %302 {offsets = [0, 0], sizes = [8, 32], strides = [1, 1]} : vector<8x96xf32> to vector<8x32xf32>
    %305 = arith.addf %303, %304 : vector<8x32xf32>
    %306 = arith.negf %305 : vector<8x32xf32>
    %307 = math.exp %306 : vector<8x32xf32>
    %cst_59 = arith.constant 1.000000e+00 : f32
    %308 = vector.broadcast %cst_59 : f32 to vector<8x32xf32>
    %309 = arith.addf %308, %307 : vector<8x32xf32>
    %310 = arith.divf %308, %309 : vector<8x32xf32>
    %311 = vector.extract_strided_slice %244 {offsets = [16, 32], sizes = [8, 32], strides = [1, 1]} : vector<64x96xf32> to vector<8x32xf32>
    %312 = vector.extract_strided_slice %302 {offsets = [0, 32], sizes = [8, 32], strides = [1, 1]} : vector<8x96xf32> to vector<8x32xf32>
    %313 = arith.addf %311, %312 : vector<8x32xf32>
    %314 = arith.negf %313 : vector<8x32xf32>
    %315 = math.exp %314 : vector<8x32xf32>
    %cst_60 = arith.constant 1.000000e+00 : f32
    %316 = vector.broadcast %cst_60 : f32 to vector<8x32xf32>
    %317 = arith.addf %316, %315 : vector<8x32xf32>
    %318 = arith.divf %316, %317 : vector<8x32xf32>
    %319 = vector.extract_strided_slice %244 {offsets = [16, 64], sizes = [8, 32], strides = [1, 1]} : vector<64x96xf32> to vector<8x32xf32>
    %320 = vector.extract_strided_slice %302 {offsets = [0, 64], sizes = [8, 32], strides = [1, 1]} : vector<8x96xf32> to vector<8x32xf32>
    %321 = arith.addf %320, %241 : vector<8x32xf32>
    %322 = arith.mulf %310, %321 : vector<8x32xf32>
    %323 = arith.addf %319, %322 : vector<8x32xf32>
    %324 = math.tanh %323 : vector<8x32xf32>
    %cst_61 = arith.constant 1.000000e+00 : f32
    %325 = vector.broadcast %cst_61 : f32 to vector<8x32xf32>
    %326 = arith.subf %325, %318 : vector<8x32xf32>
    %327 = arith.mulf %326, %324 : vector<8x32xf32>
    %328 = arith.mulf %318, %301 : vector<8x32xf32>
    %329 = arith.addf %327, %328 : vector<8x32xf32>
    %cst_62 = arith.constant dense<0.000000e+00> : vector<8x96xf32>
    %330 = tpu.matmul %329, %237, %cst_62 {dimension_numbers = #tpu.dot_dimension_numbers<[1], [0], [0], [1], [0, 0, 1, 1], [], []>} : vector<8x32xf32>, vector<32x96xf32>, vector<8x96xf32> -> vector<8x96xf32>
    %331 = vector.extract_strided_slice %244 {offsets = [24, 0], sizes = [8, 32], strides = [1, 1]} : vector<64x96xf32> to vector<8x32xf32>
    %332 = vector.extract_strided_slice %330 {offsets = [0, 0], sizes = [8, 32], strides = [1, 1]} : vector<8x96xf32> to vector<8x32xf32>
    %333 = arith.addf %331, %332 : vector<8x32xf32>
    %334 = arith.negf %333 : vector<8x32xf32>
    %335 = math.exp %334 : vector<8x32xf32>
    %cst_63 = arith.constant 1.000000e+00 : f32
    %336 = vector.broadcast %cst_63 : f32 to vector<8x32xf32>
    %337 = arith.addf %336, %335 : vector<8x32xf32>
    %338 = arith.divf %336, %337 : vector<8x32xf32>
    %339 = vector.extract_strided_slice %244 {offsets = [24, 32], sizes = [8, 32], strides = [1, 1]} : vector<64x96xf32> to vector<8x32xf32>
    %340 = vector.extract_strided_slice %330 {offsets = [0, 32], sizes = [8, 32], strides = [1, 1]} : vector<8x96xf32> to vector<8x32xf32>
    %341 = arith.addf %339, %340 : vector<8x32xf32>
    %342 = arith.negf %341 : vector<8x32xf32>
    %343 = math.exp %342 : vector<8x32xf32>
    %cst_64 = arith.constant 1.000000e+00 : f32
    %344 = vector.broadcast %cst_64 : f32 to vector<8x32xf32>
    %345 = arith.addf %344, %343 : vector<8x32xf32>
    %346 = arith.divf %344, %345 : vector<8x32xf32>
    %347 = vector.extract_strided_slice %244 {offsets = [24, 64], sizes = [8, 32], strides = [1, 1]} : vector<64x96xf32> to vector<8x32xf32>
    %348 = vector.extract_strided_slice %330 {offsets = [0, 64], sizes = [8, 32], strides = [1, 1]} : vector<8x96xf32> to vector<8x32xf32>
    %349 = arith.addf %348, %241 : vector<8x32xf32>
    %350 = arith.mulf %338, %349 : vector<8x32xf32>
    %351 = arith.addf %347, %350 : vector<8x32xf32>
    %352 = math.tanh %351 : vector<8x32xf32>
    %cst_65 = arith.constant 1.000000e+00 : f32
    %353 = vector.broadcast %cst_65 : f32 to vector<8x32xf32>
    %354 = arith.subf %353, %346 : vector<8x32xf32>
    %355 = arith.mulf %354, %352 : vector<8x32xf32>
    %356 = arith.mulf %346, %329 : vector<8x32xf32>
    %357 = arith.addf %355, %356 : vector<8x32xf32>
    %cst_66 = arith.constant dense<0.000000e+00> : vector<8x96xf32>
    %358 = tpu.matmul %357, %237, %cst_66 {dimension_numbers = #tpu.dot_dimension_numbers<[1], [0], [0], [1], [0, 0, 1, 1], [], []>} : vector<8x32xf32>, vector<32x96xf32>, vector<8x96xf32> -> vector<8x96xf32>
    %359 = vector.extract_strided_slice %244 {offsets = [32, 0], sizes = [8, 32], strides = [1, 1]} : vector<64x96xf32> to vector<8x32xf32>
    %360 = vector.extract_strided_slice %358 {offsets = [0, 0], sizes = [8, 32], strides = [1, 1]} : vector<8x96xf32> to vector<8x32xf32>
    %361 = arith.addf %359, %360 : vector<8x32xf32>
    %362 = arith.negf %361 : vector<8x32xf32>
    %363 = math.exp %362 : vector<8x32xf32>
    %cst_67 = arith.constant 1.000000e+00 : f32
    %364 = vector.broadcast %cst_67 : f32 to vector<8x32xf32>
    %365 = arith.addf %364, %363 : vector<8x32xf32>
    %366 = arith.divf %364, %365 : vector<8x32xf32>
    %367 = vector.extract_strided_slice %244 {offsets = [32, 32], sizes = [8, 32], strides = [1, 1]} : vector<64x96xf32> to vector<8x32xf32>
    %368 = vector.extract_strided_slice %358 {offsets = [0, 32], sizes = [8, 32], strides = [1, 1]} : vector<8x96xf32> to vector<8x32xf32>
    %369 = arith.addf %367, %368 : vector<8x32xf32>
    %370 = arith.negf %369 : vector<8x32xf32>
    %371 = math.exp %370 : vector<8x32xf32>
    %cst_68 = arith.constant 1.000000e+00 : f32
    %372 = vector.broadcast %cst_68 : f32 to vector<8x32xf32>
    %373 = arith.addf %372, %371 : vector<8x32xf32>
    %374 = arith.divf %372, %373 : vector<8x32xf32>
    %375 = vector.extract_strided_slice %244 {offsets = [32, 64], sizes = [8, 32], strides = [1, 1]} : vector<64x96xf32> to vector<8x32xf32>
    %376 = vector.extract_strided_slice %358 {offsets = [0, 64], sizes = [8, 32], strides = [1, 1]} : vector<8x96xf32> to vector<8x32xf32>
    %377 = arith.addf %376, %241 : vector<8x32xf32>
    %378 = arith.mulf %366, %377 : vector<8x32xf32>
    %379 = arith.addf %375, %378 : vector<8x32xf32>
    %380 = math.tanh %379 : vector<8x32xf32>
    %cst_69 = arith.constant 1.000000e+00 : f32
    %381 = vector.broadcast %cst_69 : f32 to vector<8x32xf32>
    %382 = arith.subf %381, %374 : vector<8x32xf32>
    %383 = arith.mulf %382, %380 : vector<8x32xf32>
    %384 = arith.mulf %374, %357 : vector<8x32xf32>
    %385 = arith.addf %383, %384 : vector<8x32xf32>
    %cst_70 = arith.constant dense<0.000000e+00> : vector<8x96xf32>
    %386 = tpu.matmul %385, %237, %cst_70 {dimension_numbers = #tpu.dot_dimension_numbers<[1], [0], [0], [1], [0, 0, 1, 1], [], []>} : vector<8x32xf32>, vector<32x96xf32>, vector<8x96xf32> -> vector<8x96xf32>
    %387 = vector.extract_strided_slice %244 {offsets = [40, 0], sizes = [8, 32], strides = [1, 1]} : vector<64x96xf32> to vector<8x32xf32>
    %388 = vector.extract_strided_slice %386 {offsets = [0, 0], sizes = [8, 32], strides = [1, 1]} : vector<8x96xf32> to vector<8x32xf32>
    %389 = arith.addf %387, %388 : vector<8x32xf32>
    %390 = arith.negf %389 : vector<8x32xf32>
    %391 = math.exp %390 : vector<8x32xf32>
    %cst_71 = arith.constant 1.000000e+00 : f32
    %392 = vector.broadcast %cst_71 : f32 to vector<8x32xf32>
    %393 = arith.addf %392, %391 : vector<8x32xf32>
    %394 = arith.divf %392, %393 : vector<8x32xf32>
    %395 = vector.extract_strided_slice %244 {offsets = [40, 32], sizes = [8, 32], strides = [1, 1]} : vector<64x96xf32> to vector<8x32xf32>
    %396 = vector.extract_strided_slice %386 {offsets = [0, 32], sizes = [8, 32], strides = [1, 1]} : vector<8x96xf32> to vector<8x32xf32>
    %397 = arith.addf %395, %396 : vector<8x32xf32>
    %398 = arith.negf %397 : vector<8x32xf32>
    %399 = math.exp %398 : vector<8x32xf32>
    %cst_72 = arith.constant 1.000000e+00 : f32
    %400 = vector.broadcast %cst_72 : f32 to vector<8x32xf32>
    %401 = arith.addf %400, %399 : vector<8x32xf32>
    %402 = arith.divf %400, %401 : vector<8x32xf32>
    %403 = vector.extract_strided_slice %244 {offsets = [40, 64], sizes = [8, 32], strides = [1, 1]} : vector<64x96xf32> to vector<8x32xf32>
    %404 = vector.extract_strided_slice %386 {offsets = [0, 64], sizes = [8, 32], strides = [1, 1]} : vector<8x96xf32> to vector<8x32xf32>
    %405 = arith.addf %404, %241 : vector<8x32xf32>
    %406 = arith.mulf %394, %405 : vector<8x32xf32>
    %407 = arith.addf %403, %406 : vector<8x32xf32>
    %408 = math.tanh %407 : vector<8x32xf32>
    %cst_73 = arith.constant 1.000000e+00 : f32
    %409 = vector.broadcast %cst_73 : f32 to vector<8x32xf32>
    %410 = arith.subf %409, %402 : vector<8x32xf32>
    %411 = arith.mulf %410, %408 : vector<8x32xf32>
    %412 = arith.mulf %402, %385 : vector<8x32xf32>
    %413 = arith.addf %411, %412 : vector<8x32xf32>
    %cst_74 = arith.constant dense<0.000000e+00> : vector<8x96xf32>
    %414 = tpu.matmul %413, %237, %cst_74 {dimension_numbers = #tpu.dot_dimension_numbers<[1], [0], [0], [1], [0, 0, 1, 1], [], []>} : vector<8x32xf32>, vector<32x96xf32>, vector<8x96xf32> -> vector<8x96xf32>
    %415 = vector.extract_strided_slice %244 {offsets = [48, 0], sizes = [8, 32], strides = [1, 1]} : vector<64x96xf32> to vector<8x32xf32>
    %416 = vector.extract_strided_slice %414 {offsets = [0, 0], sizes = [8, 32], strides = [1, 1]} : vector<8x96xf32> to vector<8x32xf32>
    %417 = arith.addf %415, %416 : vector<8x32xf32>
    %418 = arith.negf %417 : vector<8x32xf32>
    %419 = math.exp %418 : vector<8x32xf32>
    %cst_75 = arith.constant 1.000000e+00 : f32
    %420 = vector.broadcast %cst_75 : f32 to vector<8x32xf32>
    %421 = arith.addf %420, %419 : vector<8x32xf32>
    %422 = arith.divf %420, %421 : vector<8x32xf32>
    %423 = vector.extract_strided_slice %244 {offsets = [48, 32], sizes = [8, 32], strides = [1, 1]} : vector<64x96xf32> to vector<8x32xf32>
    %424 = vector.extract_strided_slice %414 {offsets = [0, 32], sizes = [8, 32], strides = [1, 1]} : vector<8x96xf32> to vector<8x32xf32>
    %425 = arith.addf %423, %424 : vector<8x32xf32>
    %426 = arith.negf %425 : vector<8x32xf32>
    %427 = math.exp %426 : vector<8x32xf32>
    %cst_76 = arith.constant 1.000000e+00 : f32
    %428 = vector.broadcast %cst_76 : f32 to vector<8x32xf32>
    %429 = arith.addf %428, %427 : vector<8x32xf32>
    %430 = arith.divf %428, %429 : vector<8x32xf32>
    %431 = vector.extract_strided_slice %244 {offsets = [48, 64], sizes = [8, 32], strides = [1, 1]} : vector<64x96xf32> to vector<8x32xf32>
    %432 = vector.extract_strided_slice %414 {offsets = [0, 64], sizes = [8, 32], strides = [1, 1]} : vector<8x96xf32> to vector<8x32xf32>
    %433 = arith.addf %432, %241 : vector<8x32xf32>
    %434 = arith.mulf %422, %433 : vector<8x32xf32>
    %435 = arith.addf %431, %434 : vector<8x32xf32>
    %436 = math.tanh %435 : vector<8x32xf32>
    %cst_77 = arith.constant 1.000000e+00 : f32
    %437 = vector.broadcast %cst_77 : f32 to vector<8x32xf32>
    %438 = arith.subf %437, %430 : vector<8x32xf32>
    %439 = arith.mulf %438, %436 : vector<8x32xf32>
    %440 = arith.mulf %430, %413 : vector<8x32xf32>
    %441 = arith.addf %439, %440 : vector<8x32xf32>
    %cst_78 = arith.constant dense<0.000000e+00> : vector<8x96xf32>
    %442 = tpu.matmul %441, %237, %cst_78 {dimension_numbers = #tpu.dot_dimension_numbers<[1], [0], [0], [1], [0, 0, 1, 1], [], []>} : vector<8x32xf32>, vector<32x96xf32>, vector<8x96xf32> -> vector<8x96xf32>
    %443 = vector.extract_strided_slice %244 {offsets = [56, 0], sizes = [8, 32], strides = [1, 1]} : vector<64x96xf32> to vector<8x32xf32>
    %444 = vector.extract_strided_slice %442 {offsets = [0, 0], sizes = [8, 32], strides = [1, 1]} : vector<8x96xf32> to vector<8x32xf32>
    %445 = arith.addf %443, %444 : vector<8x32xf32>
    %446 = arith.negf %445 : vector<8x32xf32>
    %447 = math.exp %446 : vector<8x32xf32>
    %cst_79 = arith.constant 1.000000e+00 : f32
    %448 = vector.broadcast %cst_79 : f32 to vector<8x32xf32>
    %449 = arith.addf %448, %447 : vector<8x32xf32>
    %450 = arith.divf %448, %449 : vector<8x32xf32>
    %451 = vector.extract_strided_slice %244 {offsets = [56, 32], sizes = [8, 32], strides = [1, 1]} : vector<64x96xf32> to vector<8x32xf32>
    %452 = vector.extract_strided_slice %442 {offsets = [0, 32], sizes = [8, 32], strides = [1, 1]} : vector<8x96xf32> to vector<8x32xf32>
    %453 = arith.addf %451, %452 : vector<8x32xf32>
    %454 = arith.negf %453 : vector<8x32xf32>
    %455 = math.exp %454 : vector<8x32xf32>
    %cst_80 = arith.constant 1.000000e+00 : f32
    %456 = vector.broadcast %cst_80 : f32 to vector<8x32xf32>
    %457 = arith.addf %456, %455 : vector<8x32xf32>
    %458 = arith.divf %456, %457 : vector<8x32xf32>
    %459 = vector.extract_strided_slice %244 {offsets = [56, 64], sizes = [8, 32], strides = [1, 1]} : vector<64x96xf32> to vector<8x32xf32>
    %460 = vector.extract_strided_slice %442 {offsets = [0, 64], sizes = [8, 32], strides = [1, 1]} : vector<8x96xf32> to vector<8x32xf32>
    %461 = arith.addf %460, %241 : vector<8x32xf32>
    %462 = arith.mulf %450, %461 : vector<8x32xf32>
    %463 = arith.addf %459, %462 : vector<8x32xf32>
    %464 = math.tanh %463 : vector<8x32xf32>
    %cst_81 = arith.constant 1.000000e+00 : f32
    %465 = vector.broadcast %cst_81 : f32 to vector<8x32xf32>
    %466 = arith.subf %465, %458 : vector<8x32xf32>
    %467 = arith.mulf %466, %464 : vector<8x32xf32>
    %468 = arith.mulf %458, %441 : vector<8x32xf32>
    %469 = arith.addf %467, %468 : vector<8x32xf32>
    %470 = tpu.concatenate %273, %301, %329, %357, %385, %413, %441, %469 in 0 : vector<8x32xf32>, vector<8x32xf32>, vector<8x32xf32>, vector<8x32xf32>, vector<8x32xf32>, vector<8x32xf32>, vector<8x32xf32>, vector<8x32xf32> -> vector<64x32xf32>
    %c2 = arith.constant 2 : index
    %c0_82 = arith.constant 0 : index
    %471 = vector.load %arg6[%c2, %c0_82] : memref<3x128xf32, #tpu.memory_space<vmem>>, vector<1x32xf32>
    %c0_83 = arith.constant 0 : index
    %c0_84 = arith.constant 0 : index
    %472 = vector.load %arg7[%c0_83, %c0_84] : memref<32x32xf32, #tpu.memory_space<vmem>>, vector<32x32xf32>
    %cst_85 = arith.constant dense<0.000000e+00> : vector<64x32xf32>
    %473 = tpu.matmul %470, %472, %cst_85 {dimension_numbers = #tpu.dot_dimension_numbers<[1], [0], [0], [1], [0, 0, 1, 1], [], []>} : vector<64x32xf32>, vector<32x32xf32>, vector<64x32xf32> -> vector<64x32xf32>
    %474 = vector.broadcast %471 : vector<1x32xf32> to vector<64x32xf32>
    %475 = arith.addf %473, %474 : vector<64x32xf32>
    %476 = arith.negf %475 : vector<64x32xf32>
    %477 = math.exp %476 : vector<64x32xf32>
    %cst_86 = arith.constant 1.000000e+00 : f32
    %478 = vector.broadcast %cst_86 : f32 to vector<64x32xf32>
    %479 = arith.addf %478, %477 : vector<64x32xf32>
    %480 = arith.divf %478, %479 : vector<64x32xf32>
    %c0_87 = arith.constant 0 : index
    %c0_88 = arith.constant 0 : index
    %481 = vector.load %arg8[%c0_87, %c0_88] : memref<64x32xf32, #tpu.memory_space<vmem>>, vector<64x32xf32>
    tpu.vector_store %arg8[%c0_87, %c0_88], %480 {strides = array<i32>} : memref<64x32xf32, #tpu.memory_space<vmem>>, vector<64x32xf32>,
    return
  }
  func.func @transform_0(%arg0: i32) -> (i32, i32) {
    %c0_i32 = arith.constant 0 : i32
    %c0_i32_0 = arith.constant 0 : i32
    %c0_i32_1 = arith.constant 0 : i32
    return %c0_i32, %c0_i32_0 : i32, i32
  }
  func.func @transform_1(%arg0: i32) -> (i32, i32) {
    %c0_i32 = arith.constant 0 : i32
    %c0_i32_0 = arith.constant 0 : i32
    %c0_i32_1 = arith.constant 0 : i32
    return %c0_i32, %c0_i32_0 : i32, i32
  }
  func.func @transform_2(%arg0: i32) -> (i32, i32) {
    %c0_i32 = arith.constant 0 : i32
    %c0_i32_0 = arith.constant 0 : i32
    %c0_i32_1 = arith.constant 0 : i32
    return %c0_i32, %c0_i32_0 : i32, i32
  }
  func.func @transform_3(%arg0: i32) -> (i32, i32) {
    %c0_i32 = arith.constant 0 : i32
    %c0_i32_0 = arith.constant 0 : i32
    %c0_i32_1 = arith.constant 0 : i32
    return %c0_i32, %c0_i32_0 : i32, i32
  }
  func.func @transform_4(%arg0: i32) -> (i32, i32) {
    %c0_i32 = arith.constant 0 : i32
    %c0_i32_0 = arith.constant 0 : i32
    %c0_i32_1 = arith.constant 0 : i32
    return %c0_i32, %c0_i32_0 : i32, i32
  }
  func.func @transform_5(%arg0: i32) -> (i32, i32) {
    %c0_i32 = arith.constant 0 : i32
    %c0_i32_0 = arith.constant 0 : i32
    %c0_i32_1 = arith.constant 0 : i32
    return %c0_i32, %c0_i32_0 : i32, i32
  }
  func.func @transform_6(%arg0: i32) -> (i32, i32) {
    %c0_i32 = arith.constant 0 : i32
    %c0_i32_0 = arith.constant 0 : i32
    %c0_i32_1 = arith.constant 0 : i32
    return %c0_i32, %c0_i32_0 : i32, i32
  }
  func.func @transform_7(%arg0: i32) -> (i32, i32) {
    %c0_i32 = arith.constant 0 : i32
    %c0_i32_0 = arith.constant 0 : i32
    %c0_i32_1 = arith.constant 0 : i32
    return %c0_i32, %c0_i32_0 : i32, i32
  }
}

</mosaic_0001>

<bundles_post_ra>
// kernel: tpu_custom_call.1
= control target key start
LH: loop header
LB: loop body
LE: loop exit
PB: predicated region body
PF: predicated region fallthrough
CT: control target
= control target key end

     0   :  { %12 = vsyncpa [#allocation3], 0  ;;  %s3347_s0 = inlined_call_operand.vmem [shape: f32[64,8], index: 0, kind: input, shape index: {}]   ;;  %s3348_s1 = inlined_call_operand.vmem [shape: f32[8,96], index: 1, kind: input, shape index: {}]   ;;  %s3349_s2 = inlined_call_operand.vmem [shape: f32[32,96], index: 2, kind: input, shape index: {}]   ;;  %s3350_s3 = inlined_call_operand.vmem [shape: f32[32,96], index: 3, kind: input, shape index: {}]   ;;  %s3351_s4 = inlined_call_operand.hbm [shape: f32[32,96], index: 4, kind: input, shape index: {}]   ;;  %s3352_s5 = inlined_call_operand.vmem [shape: f32[3,128], index: 5, kind: input, shape index: {}]   ;;  %s3353_s6 = inlined_call_operand.hbm [shape: f32[32,32], index: 6, kind: input, shape index: {}]   ;;  %s3354_s7 = inlined_call_operand.vmem [shape: f32[64,32], index: 7, kind: output, shape index: {}]  }
   0x1   :  { %13 = vsyncpa [#allocation5], 0  ;;  %s2847_s24 = smov [#allocation2]   ;;  %s2799_s28 = scalar_lea.hbm %s3351_s4, 512 }
   0x2   :  { %s27_s25 = sshll.u32 %s2847_s24, 4  ;;  %p2800_p0 = scmp.ne.s32.totalorder %s3351_s4, %s2799_s28  ;;  %s28_s25 = int_to_ptr.vmem [resolvable:$true] %s27_s25 }
   0x3   :  { %p2803_p1 = scmp.lt.u32.totalorder %s2799_s28, %s3351_s4 }
   0x5   :  { %p2805_p2 = pnand %p2803_p1, %p2800_p0 }
   0x7   :  { %2808 = shalt.err (!%p2805_p2)
}
   0x8   :  { %s2809_s10 = scalar_lea.vmem %s28_s25, 512  ;;  %p2814_p4 = scmp.lt.s32.totalorder %s28_s25, %s28_s25 }
   0x9   :  { %p2810_p3 = scmp.ne.s32.totalorder %s28_s25, %s2809_s10  ;;  %p2815_p5 = scmp.lt.s32.totalorder %s2809_s10, %s2809_s10 }
   0xb   :  { %p2816_p6 = por %p2815_p5, %p2814_p4 }
   0xd   :  { %p2817_p7 = pnand %p2816_p6, %p2810_p3 }
   0xf   :  { %2820 = shalt.err (!%p2817_p7)
}
  0x10   :  { %s2848_s11 = smov 128   ;;  %s2849_s12 = smov 8  }
  0x11   :  { %33 = dma.hbm_to_vmem [thread:$0]  %s3351_s4, 512, %s28_s25, [#allocation3], %s2848_s11, %s2848_s11, %s2849_s12  }
  0x12   :  { %s2850_s15 = smov [#allocation4]   ;;  %s2821_s19 = scalar_lea.hbm %s3353_s6, 512 }
  0x13   :  { %s41_s16 = sshll.u32 %s2850_s15, 4  ;;  %p2822_p8 = scmp.ne.s32.totalorder %s3353_s6, %s2821_s19  ;;  %s42_s16 = int_to_ptr.vmem [resolvable:$true] %s41_s16 }
  0x14   :  { %p2825_p9 = scmp.lt.u32.totalorder %s2821_s19, %s3353_s6 }
  0x16   :  { %p2827_p10 = pnand %p2825_p9, %p2822_p8 }
  0x18   :  { %2830 = shalt.err (!%p2827_p10)
}
  0x19   :  { %s2831_s24 = scalar_lea.vmem %s42_s16, 512  ;;  %p2836_p12 = scmp.lt.s32.totalorder %s42_s16, %s42_s16 }
  0x1a   :  { %p2832_p11 = scmp.ne.s32.totalorder %s42_s16, %s2831_s24  ;;  %p2837_p13 = scmp.lt.s32.totalorder %s2831_s24, %s2831_s24 }
  0x1c   :  { %p2838_p0 = por %p2837_p13, %p2836_p12 }
  0x1e   :  { %p2839_p1 = pnand %p2838_p0, %p2832_p11 }
  0x20   :  { %2842 = shalt.err (!%p2839_p1)
}
  0x21   :  { %47 = dma.hbm_to_vmem [thread:$0]  %s3353_s6, 512, %s42_s16, [#allocation5], %s2848_s11, %s2848_s11, %s2849_s12  }
  0x22   :  { %2843 = dma.done.wait [#allocation3], 512  }
  0x23   :  { %2844 = vsyncadd [#allocation3], 4294966784 }
  0x24   :  { %2845 = dma.done.wait [#allocation5], 512  }
  0x25   :  { %2846 = vsyncadd [#allocation5], 4294966784  ;;  %vm72_vm0 = vcmask 64512   ;;  %v62_v0 = vld [vmem:[%s3348_s1] sm:$0xff]  ;;  %v59_v2 = vld [vmem:[%s3347_s0 + $0x28] sm:$0xff]  ;;  %v2851_v8 = vmov 0.0|0.0  }
  0x26   :  { %v58_v1 = vld [vmem:[%s3347_s0 + $0x20] sm:$0xff]  ;;  %2660 = vmatprep.subr.mxu1 %v62_v0  ;;  %v64_v4 = vld [vmem:[%s3349_s2 + $0x8] sm:$0xff]  ;;  %v60_v5 = vld [vmem:[%s3347_s0 + $0x30] sm:$0xff]  ;;  %2318 = vmatprep.subr.mxu0 %v62_v0  ;;  %vm2853_vm1 = vmmov 0   ;;  %v2854_v15 = vmov 0.0   ;;  %s2855_s4 = smov 64  }
  0x27   :  { %2326 = vmatprep.mubr.msk.f32.mxu1 %vm72_vm0, %v58_v1  ;;  %v63_v3 = vld [vmem:[%s3349_s2] sm:$0xff]  ;;  %2661 = vmatpush3.msra.mxu1 %v62_v0  ;;  %v65_v7 = vld [vmem:[%s3349_s2 + $0x10] sm:$0xff]  ;;  %v66_v10 = vld [vmem:[%s3349_s2 + $0x18] sm:$0xff]  ;;  %s2852_s2 = smov 96   ;;  %vm202_vm2 = vcmask 261120  }
  0x28   :  { %v2939_v6 = vpack.c.bf16 %v64_v4, %v63_v3  ;;  %2327 = vmatmul.mubr.msk.f32.vlgmr.msra.gmra.mrb[0].mxu1 %vm72_vm0, %v59_v2  ;;  %2548 = vmatprep.subr.bf16.mxu1 %v2851_v8  ;;  %v54_v9 = vld [vmem:[%s3347_s0] sm:$0xff]  ;;  %v61_v12 = vld [vmem:[%s3347_s0 + $0x38] sm:$0xff]  ;;  %v2962_v13 = vpack.c.bf16 %v66_v10, %v65_v7  ;;  %v55_v14 = vld [vmem:[%s3347_s0 + $0x8] sm:$0xff] }
  0x29   :  { %v2955_v11 = vld [vmem:[%s3352_s5] ss:$0 sm:$0xff]  ;;  %2329 = vmatprep.mubr.msk.f32.mxu1 %vm72_vm0, %v60_v5  ;;  %2319 = vmatpush3.msra.mxu0 %v62_v0  ;;  %v56_v56 = vld [vmem:[%s3347_s0 + $0x10] sm:$0xff]  ;;  %v57_v57 = vld [vmem:[%s3347_s0 + $0x18] sm:$0xff] }
  0x2a   :  { %2550 = vmatpush3.bf16.msra.mxu1 %v2939_v6  ;;  %2320 = vmatprep.mubr.msk.f32.mxu0 %vm72_vm0, %v54_v9 }
  0x2b   :  { %2551 = vmatprep.subr.bf16.mxu1 %v2851_v8  ;;  %284 = vrot.lane.b32.xlu0 %v2955_v11, %s2852_s2 }
  0x2c   :  { %2330 = vmatmul.mubr.msk.f32.gmra.mrb[2].mxu1 %vm72_vm0, %v61_v12  ;;  %2321 = vmatmul.mubr.msk.f32.vlgmr.msra.gmra.mrb[0].mxu0 %vm72_vm0, %v55_v14 }
  0x2d   :  { %2340 = vmatprep.mubr.msk.f32.mxu1 %vm2853_vm1, %v2854_v15  ;;  %2560 = vmatprep.subr.bf16.mxu0 %v2851_v8 }
  0x2e   :  { %2553 = vmatpush3.bf16.msra.mxu1 %v2962_v13  ;;  %2562 = vmatpush3.bf16.msra.mxu0 %v2939_v6 }
  0x2f   :  { %2554 = vmatprep.subr.bf16.mxu1 %v2851_v8  ;;  %2563 = vmatprep.subr.bf16.mxu0 %v2851_v8 }
  0x30   :  { %2323 = vmatprep.mubr.msk.f32.mxu0 %vm72_vm0, %v56_v56 }
  0x31   :  { %2341 = vmatmul.mubr.f32.vlgmr.msra.gmra.mrb[4].mxu1 %v2854_v15  ;;  %2324 = vmatmul.mubr.msk.f32.gmra.mrb[2].mxu0 %vm72_vm0, %v57_v57 }
  0x32   :  { %2556 = vmatpush3.bf16.msra.mxu1 %v2939_v6  ;;  %2351 = vmatprep.mubr.msk.f32.mxu1 %vm2853_vm1, %v2854_v15 }
  0x33   :  { %2557 = vmatprep.subr.bf16.mxu1 %v2851_v8  ;;  %2565 = vmatpush3.bf16.msra.mxu0 %v2962_v13 }
  0x34   :  { %2572 = vmatprep.subr.bf16.mxu0 %v2851_v8  ;;  %2362 = vmatprep.mubr.msk.f32.mxu0 %vm2853_vm1, %v2854_v15 }
  0x36   :  { %2559 = vmatpush3.bf16.msra.mxu1 %v2962_v13 }
  0x37   :  { %2566 = vmatprep.subr.bf16.mxu1 %v2851_v8 }
  0x9d   :  { %v2997_v22 = vpop.permute.xlu0 %284 }
  0xfb   :  { %v2989_v16 = vpop.f32.mrb[0].mxu1 }
  0xfc   :  { %v2991_v17 = vpop.f32.mrb[1].mxu1 }
  0xfd   :  { %v184_v57 = vadd.f32 %v2955_v11, %v2991_v17 }
  0xff   :  { %v2993_v18 = vpop.f32.mrb[2].mxu1  ;;  %v2322_v19 = vpop.f32.mrb[0].mxu0 }
 0x100   :  { %v2995_v20 = vpop.f32.mrb[3].mxu1  ;;  %v163_v21 = vpop.f32.mrb[1].mxu0  ;;  %v169_v46 = vadd.f32 %v2322_v19, %v2955_v11 }
 0x101   :  { %v164_v26 = vadd.f32 %v2955_v11, %v163_v21 }
 0x104   :  { %v272_v23 = vpop.f32.mrb[4].mxu1  ;;  %v2325_v0 = vpop.f32.mrb[2].mxu0 }
 0x105   :  { %v287_v24 = vadd.f32 %v2997_v22, %v272_v23  ;;  %v2342_v25 = vpop.f32.mrb[5].mxu1  ;;  %v276_v27 = vadd.f32 %v272_v23, %v164_v26  ;;  %v173_v1 = vpop.f32.mrb[3].mxu0 }
 0x106   :  { %v174_v7 = vadd.f32 %v2955_v11, %v173_v1 }
 0x107   :  { %289 = vrot.lane.b32.xlu0 %v287_v24, %s2855_s4  ;;  %v2149_v28 = vmul.f32 -1.442695, %v276_v27 }
 0x109   :  { %2671 = vpow2.f32 %v2149_v28 }
 0x113   :  { %v2672_v29 = vpop.eup %2671 }
 0x114   :  { %v280_v30 = vadd.f32 1.0, %v2672_v29 }
 0x116   :  { %2673 = vrcp.f32 %v280_v30 }
 0x120   :  { %v2674_v31 = vpop.eup %2673 }
 0x121   :  { %v299_v37 = vsub.f32 1.0, %v2674_v31  ;;  %v305_v39 = vmul.f32 0.0, %v2674_v31 }
 0x179   :  { %v290_v32 = vpop.permute.xlu0 %289 }
 0x17a   :  { %v292_v33 = vmul.f32 %v2674_v31, %v290_v32 }
 0x17c   :  { %294 = vrot.lane.b32.xlu1 %v292_v33, %s2855_s4 }
 0x1ee   :  { %v295_v34 = vpop.permute.xlu1 %294 }
 0x1ef   :  { %v297_v35 = vadd.f32 %v295_v34, %v164_v26 }
 0x1f1   :  { %2675 = vtanh.f32 %v297_v35 }
 0x1fb   :  { %v2676_v36 = vpop.eup %2675 }
 0x1fc   :  { %301 = vrot.lane.b32.xlu1 %v2676_v36, %s2852_s2  ;;  %v179_v36 = vadd.f32 %v2325_v0, %v2955_v11 }
 0x26e   :  { %v302_v38 = vpop.permute.xlu1 %301 }
 0x26f   :  { %v304_v40 = vmul.f32 %v302_v38, %v299_v37 }
 0x271   :  { %v306_v41 = vadd.f32 %v305_v39, %v304_v40 }
 0x273   :  { %308 = vrot.lane.b32.xlu0 %v306_v41, %s2852_s2 }
 0x2e5   :  { %v3005_v42 = vpop.permute.xlu0 %308 }
 0x2e6   :  { %2352 = vmatmul.mubr.msk.f32.vlgmr.msra.gmra.mrb[6].mxu1 %vm202_vm2, %v3005_v42 }
 0x2e7   :  { %2568 = vmatpush3.bf16.msra.mxu1 %v2939_v6  ;;  %2373 = vmatprep.mubr.msk.f32.mxu1 %vm2853_vm1, %v2854_v15 }
 0x2e8   :  { %2569 = vmatprep.subr.bf16.mxu1 %v2851_v8 }
 0x2eb   :  { %2571 = vmatpush3.bf16.msra.mxu1 %v2962_v13 }
 0x2ec   :  { %2578 = vmatprep.subr.bf16.mxu1 %v2851_v8 }
 0x3b9   :  { %v378_v43 = vpop.f32.mrb[6].mxu1 }
 0x3ba   :  { %v389_v44 = vadd.f32 %v378_v43, %v2997_v22  ;;  %v2353_v45 = vpop.f32.mrb[7].mxu1  ;;  %v382_v47 = vadd.f32 %v378_v43, %v169_v46 }
 0x3bc   :  { %391 = vrot.lane.b32.xlu1 %v389_v44, %s2855_s4  ;;  %v2151_v48 = vmul.f32 -1.442695, %v382_v47 }
 0x3be   :  { %2677 = vpow2.f32 %v2151_v48 }
 0x3c8   :  { %v2678_v49 = vpop.eup %2677 }
 0x3c9   :  { %v386_v50 = vadd.f32 1.0, %v2678_v49 }
 0x3cb   :  { %2679 = vrcp.f32 %v386_v50 }
 0x3d5   :  { %v2680_v51 = vpop.eup %2679 }
 0x3d6   :  { %v401_v59 = vsub.f32 1.0, %v2680_v51  ;;  %v407_v61 = vmul.f32 %v2680_v51, %v306_v41 }
 0x42e   :  { %v392_v52 = vpop.permute.xlu1 %391 }
 0x42f   :  { %v394_v53 = vmul.f32 %v2680_v51, %v392_v52 }
 0x431   :  { %396 = vrot.lane.b32.xlu0 %v394_v53, %s2855_s4 }
 0x4a3   :  { %v397_v54 = vpop.permute.xlu0 %396 }
 0x4a4   :  { %v399_v55 = vadd.f32 %v397_v54, %v169_v46 }
 0x4a6   :  { %2681 = vtanh.f32 %v399_v55 }
 0x4b0   :  { %v2682_v58 = vpop.eup %2681 }
 0x4b1   :  { %403 = vrot.lane.b32.xlu1 %v2682_v58, %s2852_s2 }
 0x523   :  { %v404_v60 = vpop.permute.xlu1 %403 }
 0x524   :  { %v406_v62 = vmul.f32 %v404_v60, %v401_v59 }
 0x526   :  { %v408_v63 = vadd.f32 %v407_v61, %v406_v62 }
 0x528   :  { %410 = vrot.lane.b32.xlu0 %v408_v63, %s2852_s2 }
 0x59a   :  { %v3031_v2 = vpop.permute.xlu0 %410 }
 0x59b   :  { %2363 = vmatmul.mubr.msk.f32.vlgmr.msra.gmra.mrb[4].mxu0 %vm202_vm2, %v3031_v2 }
 0x59c   :  { %2574 = vmatpush3.bf16.msra.mxu0 %v2939_v6  ;;  %2384 = vmatprep.mubr.msk.f32.mxu0 %vm2853_vm1, %v2854_v15 }
 0x59d   :  { %2575 = vmatprep.subr.bf16.mxu0 %v2851_v8 }
 0x5a0   :  { %2577 = vmatpush3.bf16.msra.mxu0 %v2962_v13 }
 0x5a1   :  { %2584 = vmatprep.subr.bf16.mxu0 %v2851_v8 }
 0x66e   :  { %v480_v3 = vpop.f32.mrb[4].mxu0 }
 0x66f   :  { %v491_v4 = vadd.f32 %v480_v3, %v2997_v22  ;;  %v2364_v5 = vpop.f32.mrb[5].mxu0  ;;  %v484_v9 = vadd.f32 %v480_v3, %v174_v7 }
 0x671   :  { %493 = vrot.lane.b32.xlu1 %v491_v4, %s2855_s4  ;;  %v2153_v10 = vmul.f32 -1.442695, %v484_v9 }
 0x673   :  { %2683 = vpow2.f32 %v2153_v10 }
 0x67d   :  { %v2684_v12 = vpop.eup %2683 }
 0x67e   :  { %v488_v14 = vadd.f32 1.0, %v2684_v12 }
 0x680   :  { %2685 = vrcp.f32 %v488_v14 }
 0x68a   :  { %v2686_v19 = vpop.eup %2685 }
 0x68b   :  { %v503_v27 = vsub.f32 1.0, %v2686_v19  ;;  %v509_v29 = vmul.f32 %v2686_v19, %v408_v63 }
 0x6e3   :  { %v494_v21 = vpop.permute.xlu1 %493 }
 0x6e4   :  { %v496_v23 = vmul.f32 %v2686_v19, %v494_v21 }
 0x6e6   :  { %498 = vrot.lane.b32.xlu0 %v496_v23, %s2855_s4  ;;  %v189_v23 = vadd.f32 %v2989_v16, %v2955_v11  ;;  %v1022_v16 = vld [vmem:[%s3350_s3 + $0x8] sm:$0xff] }
 0x758   :  { %v499_v24 = vpop.permute.xlu0 %498 }
 0x759   :  { %v501_v25 = vadd.f32 %v499_v24, %v174_v7 }
 0x75b   :  { %2687 = vtanh.f32 %v501_v25 }
 0x765   :  { %v2688_v26 = vpop.eup %2687 }
 0x766   :  { %505 = vrot.lane.b32.xlu1 %v2688_v26, %s2852_s2 }
 0x7d8   :  { %v506_v28 = vpop.permute.xlu1 %505 }
 0x7d9   :  { %v508_v30 = vmul.f32 %v506_v28, %v503_v27 }
 0x7db   :  { %v510_v31 = vadd.f32 %v509_v29, %v508_v30 }
 0x7dd   :  { %512 = vrot.lane.b32.xlu0 %v510_v31, %s2852_s2 }
 0x84f   :  { %v3047_v32 = vpop.permute.xlu0 %512 }
 0x850   :  { %2374 = vmatmul.mubr.msk.f32.vlgmr.msra.gmra.mrb[8].mxu1 %vm202_vm2, %v3047_v32 }
 0x851   :  { %2580 = vmatpush3.bf16.msra.mxu1 %v2939_v6  ;;  %2395 = vmatprep.mubr.msk.f32.mxu1 %vm2853_vm1, %v2854_v15 }
 0x852   :  { %2581 = vmatprep.subr.bf16.mxu1 %v2851_v8 }
 0x855   :  { %2583 = vmatpush3.bf16.msra.mxu1 %v2962_v13 }
 0x856   :  { %2590 = vmatprep.subr.bf16.mxu1 %v2851_v8 }
 0x923   :  { %v582_v33 = vpop.f32.mrb[8].mxu1 }
 0x924   :  { %v593_v34 = vadd.f32 %v582_v33, %v2997_v22  ;;  %v2375_v35 = vpop.f32.mrb[9].mxu1  ;;  %v586_v37 = vadd.f32 %v582_v33, %v179_v36 }
 0x926   :  { %595 = vrot.lane.b32.xlu1 %v593_v34, %s2855_s4  ;;  %v2155_v38 = vmul.f32 -1.442695, %v586_v37 }
 0x928   :  { %2689 = vpow2.f32 %v2155_v38 }
 0x932   :  { %v2690_v39 = vpop.eup %2689 }
 0x933   :  { %v590_v40 = vadd.f32 1.0, %v2690_v39 }
 0x935   :  { %2691 = vrcp.f32 %v590_v40  ;;  %v1023_v40 = vld [vmem:[%s3350_s3 + $0x10] sm:$0xff] }
 0x93f   :  { %v2692_v41 = vpop.eup %2691 }
 0x940   :  { %v605_v48 = vsub.f32 1.0, %v2692_v41  ;;  %v611_v50 = vmul.f32 %v2692_v41, %v510_v31  ;;  %v1021_v31 = vld [vmem:[%s3350_s3] sm:$0xff] }
 0x941   :  { %v2596_v33 = vpack.c.bf16 %v1022_v16, %v1021_v31 }
 0x998   :  { %v596_v43 = vpop.permute.xlu1 %595 }
 0x999   :  { %v598_v44 = vmul.f32 %v2692_v41, %v596_v43  ;;  %v1024_v41 = vld [vmem:[%s3350_s3 + $0x18] sm:$0xff] }
 0x99a   :  { %v2600_v43 = vpack.c.bf16 %v1024_v41, %v1023_v40 }
 0x99b   :  { %600 = vrot.lane.b32.xlu0 %v598_v44, %s2855_s4 }
 0xa0d   :  { %v601_v45 = vpop.permute.xlu0 %600 }
 0xa0e   :  { %v603_v46 = vadd.f32 %v601_v45, %v179_v36 }
 0xa10   :  { %2693 = vtanh.f32 %v603_v46 }
 0xa1a   :  { %v2694_v47 = vpop.eup %2693 }
 0xa1b   :  { %607 = vrot.lane.b32.xlu1 %v2694_v47, %s2852_s2 }
 0xa8d   :  { %v608_v49 = vpop.permute.xlu1 %607 }
 0xa8e   :  { %v610_v51 = vmul.f32 %v608_v49, %v605_v48 }
 0xa90   :  { %v612_v52 = vadd.f32 %v611_v50, %v610_v51  ;;  %v194_v51 = vadd.f32 %v2955_v11, %v2995_v20  ;;  %v3136_v20 = vld [vmem:[%s3352_s5 + $0x1] ss:$0 sm:$0xff] }
 0xa92   :  { %614 = vrot.lane.b32.xlu0 %v612_v52, %s2852_s2 }
 0xb04   :  { %v3063_v53 = vpop.permute.xlu0 %614 }
 0xb05   :  { %2385 = vmatmul.mubr.msk.f32.vlgmr.msra.gmra.mrb[6].mxu0 %vm202_vm2, %v3063_v53 }
 0xb06   :  { %2586 = vmatpush3.bf16.msra.mxu0 %v2939_v6  ;;  %2406 = vmatprep.mubr.msk.f32.mxu0 %vm2853_vm1, %v2854_v15 }
 0xb07   :  { %2587 = vmatprep.subr.bf16.mxu0 %v2851_v8 }
 0xb0a   :  { %2589 = vmatpush3.bf16.msra.mxu0 %v2962_v13 }
 0xb0b   :  { %2597 = vmatprep.subr.bf16.mxu0 %v2596_v33 }
 0xbd8   :  { %v684_v54 = vpop.f32.mrb[6].mxu0 }
 0xbd9   :  { %v695_v55 = vadd.f32 %v684_v54, %v2997_v22  ;;  %v2386_v56 = vpop.f32.mrb[7].mxu0  ;;  %v688_v58 = vadd.f32 %v684_v54, %v184_v57 }
 0xbdb   :  { %697 = vrot.lane.b32.xlu1 %v695_v55, %s2855_s4  ;;  %v2157_v59 = vmul.f32 -1.442695, %v688_v58 }
 0xbdd   :  { %2695 = vpow2.f32 %v2157_v59 }
 0xbe7   :  { %v2696_v60 = vpop.eup %2695 }
 0xbe8   :  { %v692_v61 = vadd.f32 1.0, %v2696_v60 }
 0xbea   :  { %2697 = vrcp.f32 %v692_v61 }
 0xbf4   :  { %v2698_v62 = vpop.eup %2697 }
 0xbf5   :  { %v707_v5 = vsub.f32 1.0, %v2698_v62  ;;  %v713_v17 = vmul.f32 %v2698_v62, %v612_v52 }
 0xc4d   :  { %v698_v63 = vpop.permute.xlu1 %697 }
 0xc4e   :  { %v700_v0 = vmul.f32 %v2698_v62, %v698_v63  ;;  %v1025_v62 = vld [vmem:[#allocation2] sm:$0xff]  ;;  %v1026_v63 = vld [vmem:[#allocation2 + $0x8] sm:$0xff] }
 0xc50   :  { %702 = vrot.lane.b32.xlu0 %v700_v0, %s2855_s4  ;;  %v3140_v0 = vpack.c.bf16 %v1026_v63, %v1025_v62 }
 0xcc2   :  { %v703_v1 = vpop.permute.xlu0 %702 }
 0xcc3   :  { %v705_v3 = vadd.f32 %v703_v1, %v184_v57  ;;  %v1027_v1 = vld [vmem:[#allocation2 + $0x10] sm:$0xff] }
 0xcc5   :  { %2699 = vtanh.f32 %v705_v3  ;;  %v1028_v3 = vld [vmem:[#allocation2 + $0x18] sm:$0xff] }
 0xccf   :  { %v2700_v4 = vpop.eup %2699 }
 0xcd0   :  { %709 = vrot.lane.b32.xlu1 %v2700_v4, %s2852_s2  ;;  %v3144_v4 = vpack.c.bf16 %v1028_v3, %v1027_v1 }
 0xd42   :  { %v710_v7 = vpop.permute.xlu1 %709 }
 0xd43   :  { %v712_v9 = vmul.f32 %v710_v7, %v707_v5 }
 0xd45   :  { %v714_v10 = vadd.f32 %v713_v17, %v712_v9 }
 0xd47   :  { %716 = vrot.lane.b32.xlu0 %v714_v10, %s2852_s2 }
 0xdb9   :  { %v717_v12 = vpop.permute.xlu0 %716 }
 0xdba   :  { %2396 = vmatmul.mubr.msk.f32.vlgmr.msra.gmra.mrb[10].mxu1 %vm202_vm2, %v717_v12 }
 0xdbb   :  { %2592 = vmatpush3.bf16.msra.mxu1 %v2939_v6  ;;  %2417 = vmatprep.mubr.msk.f32.mxu1 %vm2853_vm1, %v2854_v15 }
 0xdbc   :  { %2593 = vmatprep.subr.bf16.mxu1 %v2851_v8 }
 0xdbf   :  { %2595 = vmatpush3.bf16.msra.mxu1 %v2962_v13 }
 0xdc0   :  { %2604 = vmatprep.subr.bf16.mxu1 %v2851_v8 }
 0xe8d   :  { %v786_v14 = vpop.f32.mrb[10].mxu1 }
 0xe8e   :  { %v797_v19 = vadd.f32 %v786_v14, %v2997_v22  ;;  %v2397_v21 = vpop.f32.mrb[11].mxu1  ;;  %v790_v24 = vadd.f32 %v786_v14, %v189_v23 }
 0xe90   :  { %799 = vrot.lane.b32.xlu1 %v797_v19, %s2855_s4  ;;  %v2159_v6 = vmul.f32 -1.442695, %v790_v24 }
 0xe92   :  { %2701 = vpow2.f32 %v2159_v6 }
 0xe9c   :  { %v2702_v25 = vpop.eup %2701 }
 0xe9d   :  { %v794_v26 = vadd.f32 1.0, %v2702_v25 }
 0xe9f   :  { %2703 = vrcp.f32 %v794_v26 }
 0xea9   :  { %v2704_v27 = vpop.eup %2703 }
 0xeaa   :  { %v809_v35 = vsub.f32 1.0, %v2704_v27  ;;  %v815_v37 = vmul.f32 %v2704_v27, %v714_v10 }
 0xf02   :  { %v800_v28 = vpop.permute.xlu1 %799 }
 0xf03   :  { %v802_v13 = vmul.f32 %v2704_v27, %v800_v28 }
 0xf05   :  { %804 = vrot.lane.b32.xlu0 %v802_v13, %s2855_s4 }
 0xf77   :  { %v805_v29 = vpop.permute.xlu0 %804 }
 0xf78   :  { %v807_v30 = vadd.f32 %v805_v29, %v189_v23 }
 0xf7a   :  { %2705 = vtanh.f32 %v807_v30 }
 0xf84   :  { %v2706_v34 = vpop.eup %2705 }
 0xf85   :  { %811 = vrot.lane.b32.xlu1 %v2706_v34, %s2852_s2 }
 0xff7   :  { %v812_v36 = vpop.permute.xlu1 %811 }
 0xff8   :  { %v814_v38 = vmul.f32 %v812_v36, %v809_v35  ;;  %v199_v36 = vadd.f32 %v2993_v18, %v2955_v11 }
 0xffa   :  { %v816_v39 = vadd.f32 %v815_v37, %v814_v38 }
 0xffc   :  { %818 = vrot.lane.b32.xlu0 %v816_v39, %s2852_s2 }
0x106e   :  { %v819_v44 = vpop.permute.xlu0 %818 }
0x106f   :  { %2407 = vmatmul.mubr.msk.f32.vlgmr.msra.gmra.mrb[8].mxu0 %vm202_vm2, %v819_v44 }
0x1070   :  { %2599 = vmatpush3.bf16.msra.mxu0 %v2596_v33  ;;  %2428 = vmatprep.mubr.msk.f32.mxu0 %vm202_vm2, %v3005_v42 }
0x1071   :  { %2601 = vmatprep.subr.bf16.mxu0 %v2600_v43 }
0x1074   :  { %2603 = vmatpush3.bf16.msra.mxu0 %v2600_v43 }
0x1075   :  { %2616 = vmatprep.subr.bf16.mxu0 %v2851_v8 }
0x1077   :  { %2429 = vmatmul.mubr.msk.f32.vlgmr.msra.gmra.mrb[10].mxu0 %vm202_vm2, %v3031_v2 }
0x1078   :  { %2431 = vmatprep.mubr.msk.f32.mxu0 %vm202_vm2, %v3047_v32  ;;  %2618 = vmatpush3.bf16.msra.mxu0 %v3140_v0 }
0x1079   :  { %2619 = vmatprep.subr.bf16.mxu0 %v2851_v8 }
0x107b   :  { %2432 = vmatmul.mubr.msk.f32.gmra.mrb[12].mxu0 %vm202_vm2, %v3063_v53 }
0x107c   :  { %2434 = vmatprep.mubr.msk.f32.mxu0 %vm202_vm2, %v717_v12  ;;  %2621 = vmatpush3.bf16.msra.mxu0 %v3144_v4 }
0x107d   :  { %2628 = vmatprep.subr.bf16.mxu0 %v2851_v8 }
0x107f   :  { %2435 = vmatmul.mubr.msk.f32.gmra.mrb[14].mxu0 %vm202_vm2, %v819_v44 }
0x1142   :  { %v888_v45 = vpop.f32.mrb[8].mxu0 }
0x1143   :  { %v899_v42 = vadd.f32 %v888_v45, %v2997_v22  ;;  %v2408_v46 = vpop.f32.mrb[9].mxu0  ;;  %v892_v52 = vadd.f32 %v888_v45, %v194_v51 }
0x1145   :  { %901 = vrot.lane.b32.xlu1 %v899_v42, %s2855_s4  ;;  %v2161_v53 = vmul.f32 -1.442695, %v892_v52 }
0x1147   :  { %2707 = vpow2.f32 %v2161_v53 }
0x114a   :  { %v3119_v47 = vpop.f32.mrb[10].mxu0 }
0x114b   :  { %v1105_v48 = vpop.f32.mrb[11].mxu0  ;;  %v1111_v62 = vadd.f32 %v3119_v47, %v3136_v20 }
0x114c   :  { %v1106_v25 = vadd.f32 %v3136_v20, %v1105_v48 }
0x114e   :  { %v3121_v2 = vpop.f32.mrb[12].mxu0 }
0x114f   :  { %v3123_v49 = vpop.f32.mrb[13].mxu0 }
0x1151   :  { %v2708_v54 = vpop.eup %2707 }
0x1152   :  { %v3125_v32 = vpop.f32.mrb[14].mxu0  ;;  %v896_v55 = vadd.f32 1.0, %v2708_v54 }
0x1153   :  { %v3127_v50 = vpop.f32.mrb[15].mxu0 }
0x1154   :  { %2709 = vrcp.f32 %v896_v55 }
0x115e   :  { %v2710_v56 = vpop.eup %2709 }
0x115f   :  { %v911_v5 = vsub.f32 1.0, %v2710_v56  ;;  %v917_v17 = vmul.f32 %v2710_v56, %v816_v39 }
0x11b7   :  { %v902_v57 = vpop.permute.xlu1 %901 }
0x11b8   :  { %v904_v58 = vmul.f32 %v2710_v56, %v902_v57 }
0x11ba   :  { %906 = vrot.lane.b32.xlu0 %v904_v58, %s2855_s4 }
0x122c   :  { %v907_v59 = vpop.permute.xlu0 %906 }
0x122d   :  { %v909_v60 = vadd.f32 %v907_v59, %v194_v51 }
0x122f   :  { %2711 = vtanh.f32 %v909_v60 }
0x1239   :  { %v2712_v61 = vpop.eup %2711 }
0x123a   :  { %913 = vrot.lane.b32.xlu1 %v2712_v61, %s2852_s2 }
0x123e   :  { %1222 = vrot.lane.b32.xlu1 %v3136_v20, %s2852_s2 }
0x12ac   :  { %v914_v7 = vpop.permute.xlu1 %913 }
0x12ad   :  { %v916_v9 = vmul.f32 %v914_v7, %v911_v5 }
0x12af   :  { %v3148_v10 = vadd.f32 %v917_v17, %v916_v9 }
0x12b0   :  { %v3167_v21 = vpop.permute.xlu1 %1222 }
0x12b1   :  { %920 = vrot.lane.b32.xlu0 %v3148_v10, %s2852_s2 }
0x1323   :  { %v921_v12 = vpop.permute.xlu0 %920 }
0x1324   :  { %2418 = vmatmul.mubr.msk.f32.vlgmr.msra.gmra.mrb[12].mxu1 %vm202_vm2, %v921_v12  ;;  %2437 = vmatprep.mubr.msk.f32.mxu0 %vm202_vm2, %v921_v12 }
0x1325   :  { %2606 = vmatpush3.bf16.msra.mxu1 %v3140_v0  ;;  %2448 = vmatprep.mubr.msk.f32.mxu1 %vm2853_vm1, %v2854_v15 }
0x1326   :  { %2607 = vmatprep.subr.bf16.mxu1 %v2851_v8 }
0x1329   :  { %2609 = vmatpush3.bf16.msra.mxu1 %v3144_v4 }
0x132a   :  { %2610 = vmatprep.subr.bf16.mxu1 %v2851_v8 }
0x132c   :  { %2449 = vmatmul.mubr.f32.vlgmr.msra.gmra.mrb[14].mxu1 %v2854_v15 }
0x132d   :  { %2612 = vmatpush3.bf16.msra.mxu1 %v3140_v0  ;;  %2459 = vmatprep.mubr.msk.f32.mxu1 %vm2853_vm1, %v2854_v15 }
0x132e   :  { %2613 = vmatprep.subr.bf16.mxu1 %v2851_v8 }
0x1331   :  { %2615 = vmatpush3.bf16.msra.mxu1 %v3144_v4 }
0x1332   :  { %2622 = vmatprep.subr.bf16.mxu1 %v2851_v8 }
0x13f7   :  { %v990_v14 = vpop.f32.mrb[12].mxu1 }
0x13f8   :  { %v2419_v19 = vpop.f32.mrb[13].mxu1  ;;  %v1001_v35 = vadd.f32 %v990_v14, %v2997_v22  ;;  %v994_v37 = vadd.f32 %v990_v14, %v199_v36 }
0x13fa   :  { %v2163_v38 = vmul.f32 -1.442695, %v994_v37 }
0x13ff   :  { %v1210_v23 = vpop.f32.mrb[14].mxu1 }
0x1400   :  { %v1225_v24 = vadd.f32 %v3167_v21, %v1210_v23  ;;  %v2450_v6 = vpop.f32.mrb[15].mxu1  ;;  %v1214_v26 = vadd.f32 %v1210_v23, %v1106_v25 }
0x1402   :  { %1227 = vrot.lane.b32.xlu0 %v1225_v24, %s2855_s4  ;;  %v2173_v27 = vmul.f32 -1.442695, %v1214_v26 }
0x1404   :  { %2713 = vpow2.f32 %v2173_v27 }
0x140e   :  { %v2714_v28 = vpop.eup %2713 }
0x140f   :  { %v1218_v13 = vadd.f32 1.0, %v2714_v28 }
0x1411   :  { %2715 = vrcp.f32 %v1218_v13 }
0x141b   :  { %v2716_v29 = vpop.eup %2715 }
0x141c   :  { %v1237_v41 = vsub.f32 1.0, %v2716_v29  ;;  %v1243_v44 = vmul.f32 0.0, %v2716_v29 }
0x1474   :  { %v1228_v30 = vpop.permute.xlu0 %1227 }
0x1475   :  { %v1230_v31 = vmul.f32 %v2716_v29, %v1228_v30  ;;  %v1116_v30 = vadd.f32 %v3136_v20, %v3123_v49 }
0x1477   :  { %1232 = vrot.lane.b32.xlu1 %v1230_v31, %s2855_s4 }
0x14e9   :  { %v1233_v16 = vpop.permute.xlu1 %1232 }
0x14ea   :  { %v1235_v33 = vadd.f32 %v1233_v16, %v1106_v25 }
0x14ec   :  { %2717 = vtanh.f32 %v1235_v33 }
0x14ed   :  { %2719 = vpow2.f32 %v2163_v38 }
0x14f6   :  { %v2718_v34 = vpop.eup %2717 }
0x14f7   :  { %1239 = vrot.lane.b32.xlu0 %v2718_v34, %s2852_s2  ;;  %v2720_v39 = vpop.eup %2719 }
0x14f8   :  { %v998_v40 = vadd.f32 1.0, %v2720_v39 }
0x14fa   :  { %2721 = vrcp.f32 %v998_v40 }
0x14fb   :  { %1003 = vrot.lane.b32.xlu0 %v1001_v35, %s2855_s4 }
0x1504   :  { %v2722_v46 = vpop.eup %2721 }
0x1505   :  { %v1013_v53 = vsub.f32 1.0, %v2722_v46  ;;  %v1019_v55 = vmul.f32 %v2722_v46, %v3148_v10 }
0x1569   :  { %v1240_v43 = vpop.permute.xlu0 %1239 }
0x156a   :  { %v1242_v45 = vmul.f32 %v1240_v43, %v1237_v41 }
0x156c   :  { %v1244_v42 = vadd.f32 %v1243_v44, %v1242_v45 }
0x156d   :  { %v1004_v48 = vpop.permute.xlu0 %1003 }
0x156e   :  { %v1006_v51 = vmul.f32 %v2722_v46, %v1004_v48  ;;  %1246 = vrot.lane.b32.xlu1 %v1244_v42, %s2852_s2 }
0x1570   :  { %1008 = vrot.lane.b32.xlu0 %v1006_v51, %s2855_s4 }
0x15e0   :  { %v3180_v22 = vpop.permute.xlu1 %1246 }
0x15e1   :  { %2460 = vmatmul.mubr.msk.f32.vlgmr.msra.gmra.mrb[16].mxu1 %vm202_vm2, %v3180_v22 }
0x15e2   :  { %v1009_v11 = vpop.permute.xlu0 %1008  ;;  %2624 = vmatpush3.bf16.msra.mxu1 %v3140_v0  ;;  %2481 = vmatprep.mubr.msk.f32.mxu1 %vm2853_vm1, %v2854_v15 }
0x15e3   :  { %v1011_v18 = vadd.f32 %v1009_v11, %v199_v36  ;;  %2625 = vmatprep.subr.bf16.mxu1 %v2851_v8  ;;  %v1121_v11 = vadd.f32 %v3121_v2, %v3136_v20 }
0x15e5   :  { %2723 = vtanh.f32 %v1011_v18 }
0x15e6   :  { %2627 = vmatpush3.bf16.msra.mxu1 %v3144_v4 }
0x15e7   :  { %2634 = vmatprep.subr.bf16.mxu1 %v2851_v8 }
0x15ef   :  { %v2724_v52 = vpop.eup %2723 }
0x15f0   :  { %1015 = vrot.lane.b32.xlu0 %v2724_v52, %s2852_s2 }
0x1662   :  { %v1016_v54 = vpop.permute.xlu0 %1015 }
0x1663   :  { %v1018_v56 = vmul.f32 %v1016_v54, %v1013_v53 }
0x1665   :  { %v1020_v57 = vadd.f32 %v1019_v55, %v1018_v56 }
0x1667   :  { %1035 = vrot.lane.b32.xlu0 %v1020_v57, %s2852_s2 }
0x16b4   :  { %v1316_v58 = vpop.f32.mrb[16].mxu1 }
0x16b5   :  { %v1327_v59 = vadd.f32 %v1316_v58, %v3167_v21  ;;  %v2461_v60 = vpop.f32.mrb[17].mxu1  ;;  %v1320_v63 = vadd.f32 %v1316_v58, %v1111_v62 }
0x16b7   :  { %1329 = vrot.lane.b32.xlu1 %v1327_v59, %s2855_s4  ;;  %v2175_v1 = vmul.f32 -1.442695, %v1320_v63 }
0x16b9   :  { %2725 = vpow2.f32 %v2175_v1 }
0x16c3   :  { %v2726_v3 = vpop.eup %2725 }
0x16c4   :  { %v1324_v5 = vadd.f32 1.0, %v2726_v3 }
0x16c6   :  { %2727 = vrcp.f32 %v1324_v5 }
0x16d0   :  { %v2728_v7 = vpop.eup %2727 }
0x16d1   :  { %v1339_v23 = vsub.f32 1.0, %v2728_v7  ;;  %v1345_v6 = vmul.f32 %v2728_v7, %v1244_v42 }
0x16d9   :  { %v1036_v61 = vpop.permute.xlu0 %1035 }
0x16da   :  { %2438 = vmatmul.mubr.msk.f32.gmra.mrb[16].mxu0 %vm202_vm2, %v1036_v61 }
0x16db   :  { %2470 = vmatprep.mubr.msk.f32.mxu0 %vm2853_vm1, %v2854_v15 }
0x1729   :  { %v1330_v17 = vpop.permute.xlu1 %1329 }
0x172a   :  { %v1332_v9 = vmul.f32 %v2728_v7, %v1330_v17 }
0x172c   :  { %1334 = vrot.lane.b32.xlu1 %v1332_v9, %s2855_s4  ;;  %v1126_v9 = vadd.f32 %v3136_v20, %v3127_v50 }
0x179e   :  { %v1335_v10 = vpop.permute.xlu1 %1334 }
0x179f   :  { %v1337_v12 = vadd.f32 %v1335_v10, %v1111_v62 }
0x17a1   :  { %2729 = vtanh.f32 %v1337_v12 }
0x17ab   :  { %v2730_v14 = vpop.eup %2729 }
0x17ac   :  { %1341 = vrot.lane.b32.xlu1 %v2730_v14, %s2852_s2 }
0x17ad   :  { %v3202_v19 = vpop.f32.mrb[16].mxu0 }
0x17ae   :  { %v3204_v47 = vpop.f32.mrb[17].mxu0 }
0x181e   :  { %v1342_v24 = vpop.permute.xlu1 %1341 }
0x181f   :  { %v1344_v25 = vmul.f32 %v1342_v24, %v1339_v23 }
0x1821   :  { %v1346_v26 = vadd.f32 %v1345_v6, %v1344_v25 }
0x1823   :  { %1348 = vrot.lane.b32.xlu1 %v1346_v26, %s2852_s2 }
0x1895   :  { %v3207_v27 = vpop.permute.xlu1 %1348 }
0x1896   :  { %2471 = vmatmul.mubr.msk.f32.vlgmr.msra.gmra.mrb[18].mxu0 %vm202_vm2, %v3207_v27 }
0x1897   :  { %2630 = vmatpush3.bf16.msra.mxu0 %v3140_v0  ;;  %2492 = vmatprep.mubr.msk.f32.mxu0 %vm2853_vm1, %v2854_v15 }
0x1898   :  { %2631 = vmatprep.subr.bf16.mxu0 %v2851_v8 }
0x189b   :  { %2633 = vmatpush3.bf16.msra.mxu0 %v3144_v4 }
0x189c   :  { %2640 = vmatprep.subr.bf16.mxu0 %v2851_v8 }
0x1969   :  { %v1418_v28 = vpop.f32.mrb[18].mxu0 }
0x196a   :  { %v1429_v13 = vadd.f32 %v1418_v28, %v3167_v21  ;;  %v2472_v29 = vpop.f32.mrb[19].mxu0  ;;  %v1422_v31 = vadd.f32 %v1418_v28, %v1116_v30 }
0x196c   :  { %1431 = vrot.lane.b32.xlu0 %v1429_v13, %s2855_s4  ;;  %v2177_v16 = vmul.f32 -1.442695, %v1422_v31 }
0x196e   :  { %2731 = vpow2.f32 %v2177_v16 }
0x1978   :  { %v2732_v33 = vpop.eup %2731 }
0x1979   :  { %v1426_v34 = vadd.f32 1.0, %v2732_v33 }
0x197b   :  { %2733 = vrcp.f32 %v1426_v34 }
0x1985   :  { %v2734_v35 = vpop.eup %2733 }
0x1986   :  { %v1441_v41 = vsub.f32 1.0, %v2734_v35  ;;  %v1447_v49 = vmul.f32 %v2734_v35, %v1346_v26 }
0x19de   :  { %v1432_v36 = vpop.permute.xlu0 %1431 }
0x19df   :  { %v1434_v37 = vmul.f32 %v2734_v35, %v1432_v36 }
0x19e1   :  { %1436 = vrot.lane.b32.xlu1 %v1434_v37, %s2855_s4  ;;  %v1131_v37 = vadd.f32 %v3125_v32, %v3136_v20 }
0x1a53   :  { %v1437_v38 = vpop.permute.xlu1 %1436 }
0x1a54   :  { %v1439_v39 = vadd.f32 %v1437_v38, %v1116_v30 }
0x1a56   :  { %2735 = vtanh.f32 %v1439_v39 }
0x1a60   :  { %v2736_v40 = vpop.eup %2735 }
0x1a61   :  { %1443 = vrot.lane.b32.xlu0 %v2736_v40, %s2852_s2 }
0x1ad3   :  { %v1444_v43 = vpop.permute.xlu0 %1443 }
0x1ad4   :  { %v1446_v44 = vmul.f32 %v1444_v43, %v1441_v41 }
0x1ad6   :  { %v1448_v45 = vadd.f32 %v1447_v49, %v1446_v44  ;;  %v1960_v49 = vld [vmem:[#allocation4] sm:$0xff]  ;;  %v1961_v44 = vld [vmem:[#allocation4 + $0x8] sm:$0xff] }
0x1ad8   :  { %1450 = vrot.lane.b32.xlu1 %v1448_v45, %s2852_s2 }
0x1b4a   :  { %v3224_v42 = vpop.permute.xlu1 %1450 }
0x1b4b   :  { %2482 = vmatmul.mubr.msk.f32.vlgmr.msra.gmra.mrb[18].mxu1 %vm202_vm2, %v3224_v42 }
0x1b4c   :  { %2636 = vmatpush3.bf16.msra.mxu1 %v3140_v0  ;;  %2503 = vmatprep.mubr.msk.f32.mxu1 %vm2853_vm1, %v2854_v15 }
0x1b4d   :  { %2637 = vmatprep.subr.bf16.mxu1 %v2851_v8 }
0x1b50   :  { %2639 = vmatpush3.bf16.msra.mxu1 %v3144_v4 }
0x1b51   :  { %2646 = vmatprep.subr.bf16.mxu1 %v2851_v8 }
0x1c1e   :  { %v1520_v46 = vpop.f32.mrb[18].mxu1 }
0x1c1f   :  { %v1531_v48 = vadd.f32 %v1520_v46, %v3167_v21  ;;  %v2483_v51 = vpop.f32.mrb[19].mxu1  ;;  %v1524_v18 = vadd.f32 %v1520_v46, %v1121_v11 }
0x1c21   :  { %1533 = vrot.lane.b32.xlu0 %v1531_v48, %s2855_s4  ;;  %v2179_v52 = vmul.f32 -1.442695, %v1524_v18 }
0x1c23   :  { %2737 = vpow2.f32 %v2179_v52  ;;  %v1962_v52 = vld [vmem:[#allocation4 + $0x10] sm:$0xff] }
0x1c2d   :  { %v2738_v53 = vpop.eup %2737 }
0x1c2e   :  { %v1528_v54 = vadd.f32 1.0, %v2738_v53  ;;  %v1963_v53 = vld [vmem:[#allocation4 + $0x18] sm:$0xff] }
0x1c30   :  { %2739 = vrcp.f32 %v1528_v54  ;;  %v2656_v54 = vpack.c.bf16 %v1963_v53, %v1962_v52 }
0x1c3a   :  { %v2740_v55 = vpop.eup %2739 }
0x1c3b   :  { %v1543_v61 = vsub.f32 1.0, %v2740_v55  ;;  %v1549_v2 = vmul.f32 %v2740_v55, %v1448_v45  ;;  %v2652_v45 = vpack.c.bf16 %v1961_v44, %v1960_v49 }
0x1c93   :  { %v1534_v56 = vpop.permute.xlu0 %1533 }
0x1c94   :  { %v1536_v57 = vmul.f32 %v2740_v55, %v1534_v56 }
0x1c96   :  { %1538 = vrot.lane.b32.xlu1 %v1536_v57, %s2855_s4 }
0x1d08   :  { %v1539_v58 = vpop.permute.xlu1 %1538 }
0x1d09   :  { %v1541_v59 = vadd.f32 %v1539_v58, %v1121_v11 }
0x1d0b   :  { %2741 = vtanh.f32 %v1541_v59 }
0x1d15   :  { %v2742_v60 = vpop.eup %2741 }
0x1d16   :  { %1545 = vrot.lane.b32.xlu0 %v2742_v60, %s2852_s2 }
0x1d88   :  { %v1546_v62 = vpop.permute.xlu0 %1545 }
0x1d89   :  { %v1548_v63 = vmul.f32 %v1546_v62, %v1543_v61 }
0x1d8b   :  { %v1550_v1 = vadd.f32 %v1549_v2, %v1548_v63 }
0x1d8d   :  { %1552 = vrot.lane.b32.xlu1 %v1550_v1, %s2852_s2 }
0x1dff   :  { %v3241_v3 = vpop.permute.xlu1 %1552 }
0x1e00   :  { %2493 = vmatmul.mubr.msk.f32.vlgmr.msra.gmra.mrb[20].mxu0 %vm202_vm2, %v3241_v3 }
0x1e01   :  { %2642 = vmatpush3.bf16.msra.mxu0 %v3140_v0  ;;  %2514 = vmatprep.mubr.msk.f32.mxu0 %vm2853_vm1, %v2854_v15 }
0x1e02   :  { %2643 = vmatprep.subr.bf16.mxu0 %v2851_v8 }
0x1e05   :  { %2645 = vmatpush3.bf16.msra.mxu0 %v3144_v4 }
0x1e06   :  { %2653 = vmatprep.subr.bf16.mxu0 %v2652_v45 }
0x1ed3   :  { %v1622_v5 = vpop.f32.mrb[20].mxu0 }
0x1ed4   :  { %v1633_v7 = vadd.f32 %v1622_v5, %v3167_v21  ;;  %v2494_v17 = vpop.f32.mrb[21].mxu0  ;;  %v1626_v10 = vadd.f32 %v1622_v5, %v1126_v9 }
0x1ed6   :  { %1635 = vrot.lane.b32.xlu0 %v1633_v7, %s2855_s4  ;;  %v2181_v12 = vmul.f32 -1.442695, %v1626_v10 }
0x1ed8   :  { %2743 = vpow2.f32 %v2181_v12 }
0x1ee2   :  { %v2744_v14 = vpop.eup %2743 }
0x1ee3   :  { %v1630_v23 = vadd.f32 1.0, %v2744_v14 }
0x1ee5   :  { %2745 = vrcp.f32 %v1630_v23 }
0x1eef   :  { %v2746_v24 = vpop.eup %2745 }
0x1ef0   :  { %v1645_v29 = vsub.f32 1.0, %v2746_v24  ;;  %v1651_v50 = vmul.f32 %v2746_v24, %v1550_v1 }
0x1f48   :  { %v1636_v6 = vpop.permute.xlu0 %1635 }
0x1f49   :  { %v1638_v25 = vmul.f32 %v2746_v24, %v1636_v6 }
0x1f4b   :  { %1640 = vrot.lane.b32.xlu1 %v1638_v25, %s2855_s4 }
0x1fbd   :  { %v1641_v26 = vpop.permute.xlu1 %1640 }
0x1fbe   :  { %v1643_v28 = vadd.f32 %v1641_v26, %v1126_v9 }
0x1fc0   :  { %2747 = vtanh.f32 %v1643_v28 }
0x1fca   :  { %v2748_v13 = vpop.eup %2747 }
0x1fcb   :  { %1647 = vrot.lane.b32.xlu0 %v2748_v13, %s2852_s2 }
0x203d   :  { %v1648_v30 = vpop.permute.xlu0 %1647 }
0x203e   :  { %v1650_v31 = vmul.f32 %v1648_v30, %v1645_v29 }
0x2040   :  { %v1652_v16 = vadd.f32 %v1651_v50, %v1650_v31 }
0x2042   :  { %1654 = vrot.lane.b32.xlu1 %v1652_v16, %s2852_s2 }
0x20b4   :  { %v1655_v33 = vpop.permute.xlu1 %1654 }
0x20b5   :  { %2504 = vmatmul.mubr.msk.f32.vlgmr.msra.gmra.mrb[20].mxu1 %vm202_vm2, %v1655_v33 }
0x20b6   :  { %2648 = vmatpush3.bf16.msra.mxu1 %v3140_v0  ;;  %2525 = vmatprep.mubr.msk.f32.mxu1 %vm2853_vm1, %v2854_v15 }
0x20b7   :  { %2649 = vmatprep.subr.bf16.mxu1 %v2851_v8 }
0x20ba   :  { %2651 = vmatpush3.bf16.msra.mxu1 %v3144_v4 }
0x2188   :  { %v1724_v34 = vpop.f32.mrb[20].mxu1 }
0x2189   :  { %v1735_v35 = vadd.f32 %v1724_v34, %v3167_v21  ;;  %v2505_v36 = vpop.f32.mrb[21].mxu1  ;;  %v1728_v38 = vadd.f32 %v1724_v34, %v1131_v37 }
0x218b   :  { %1737 = vrot.lane.b32.xlu0 %v1735_v35, %s2855_s4  ;;  %v2183_v39 = vmul.f32 -1.442695, %v1728_v38 }
0x218d   :  { %2749 = vpow2.f32 %v2183_v39 }
0x2197   :  { %v2750_v0 = vpop.eup %2749 }
0x2198   :  { %v1732_v40 = vadd.f32 1.0, %v2750_v0  ;;  %v1136_v0 = vadd.f32 %v3136_v20, %v3204_v47 }
0x219a   :  { %2751 = vrcp.f32 %v1732_v40 }
0x21a4   :  { %v2752_v15 = vpop.eup %2751 }
0x21a5   :  { %v1747_v32 = vsub.f32 1.0, %v2752_v15  ;;  %v1753_v51 = vmul.f32 %v2752_v15, %v1652_v16 }
0x21fd   :  { %v1738_v41 = vpop.permute.xlu0 %1737 }
0x21fe   :  { %v1740_v8 = vmul.f32 %v2752_v15, %v1738_v41 }
0x2200   :  { %1742 = vrot.lane.b32.xlu1 %v1740_v8, %s2855_s4 }
0x2272   :  { %v1743_v4 = vpop.permute.xlu1 %1742 }
0x2273   :  { %v1745_v43 = vadd.f32 %v1743_v4, %v1131_v37 }
0x2275   :  { %2753 = vtanh.f32 %v1745_v43 }
0x227f   :  { %v2754_v46 = vpop.eup %2753 }
0x2280   :  { %1749 = vrot.lane.b32.xlu0 %v2754_v46, %s2852_s2 }
0x22f2   :  { %v1750_v48 = vpop.permute.xlu0 %1749 }
0x22f3   :  { %v1752_v11 = vmul.f32 %v1750_v48, %v1747_v32 }
0x22f5   :  { %v3269_v18 = vadd.f32 %v1753_v51, %v1752_v11 }
0x22f7   :  { %1756 = vrot.lane.b32.xlu1 %v3269_v18, %s2852_s2 }
0x2369   :  { %v1757_v55 = vpop.permute.xlu1 %1756 }
0x236a   :  { %2515 = vmatmul.mubr.msk.f32.vlgmr.msra.gmra.mrb[22].mxu0 %vm202_vm2, %v1757_v55 }
0x236b   :  { %2655 = vmatpush3.bf16.msra.mxu0 %v2652_v45  ;;  %2536 = vmatprep.mubr.msk.f32.mxu0 %vm202_vm2, %v3180_v22  ;;  %v3289_v22 = vld [vmem:[%s3352_s5 + $0x2] ss:$0 sm:$0xff] }
0x236c   :  { %2657 = vmatprep.subr.bf16.mxu0 %v2656_v54 }
0x236f   :  { %2659 = vmatpush3.bf16.msra.mxu0 %v2656_v54 }
0x2372   :  { %2537 = vmatmul.mubr.msk.f32.vlgmr.msra.gmra.mrb[24].mxu0 %vm202_vm2, %v3207_v27 }
0x2373   :  { %2539 = vmatprep.mubr.msk.f32.mxu0 %vm202_vm2, %v3224_v42 }
0x2376   :  { %2540 = vmatmul.mubr.msk.f32.gmra.mrb[26].mxu0 %vm202_vm2, %v3241_v3 }
0x2377   :  { %2542 = vmatprep.mubr.msk.f32.mxu0 %vm202_vm2, %v1655_v33 }
0x237a   :  { %2543 = vmatmul.mubr.msk.f32.gmra.mrb[28].mxu0 %vm202_vm2, %v1757_v55 }
0x243d   :  { %v1826_v56 = vpop.f32.mrb[22].mxu0 }
0x243e   :  { %v1837_v57 = vadd.f32 %v1826_v56, %v3167_v21  ;;  %v2516_v58 = vpop.f32.mrb[23].mxu0  ;;  %v1830_v40 = vadd.f32 %v1826_v56, %v1136_v0  ;;  %v1141_v56 = vadd.f32 %v3202_v19, %v3136_v20 }
0x2440   :  { %1839 = vrot.lane.b32.xlu0 %v1837_v57, %s2855_s4  ;;  %v2185_v15 = vmul.f32 -1.442695, %v1830_v40 }
0x2445   :  { %v2538_v27 = vpop.f32.mrb[24].mxu0 }
0x2446   :  { %v2045_v42 = vadd.f32 %v2538_v27, %v3289_v22  ;;  %v2039_v59 = vpop.f32.mrb[25].mxu0 }
0x2447   :  { %v2040_v60 = vadd.f32 %v3289_v22, %v2039_v59 }
0x2448   :  { %v2198_v61 = vmul.f32 -1.442695, %v2045_v42 }
0x2449   :  { %v2197_v62 = vmul.f32 -1.442695, %v2040_v60  ;;  %v2541_v2 = vpop.f32.mrb[26].mxu0 }
0x244a   :  { %2755 = vpow2.f32 %v2198_v61  ;;  %v2055_v63 = vadd.f32 %v2541_v2, %v3289_v22  ;;  %v2049_v1 = vpop.f32.mrb[27].mxu0 }
0x244b   :  { %2757 = vpow2.f32 %v2197_v62  ;;  %v2050_v3 = vadd.f32 %v3289_v22, %v2049_v1 }
0x244c   :  { %v2200_v5 = vmul.f32 -1.442695, %v2055_v63 }
0x244d   :  { %v2199_v7 = vmul.f32 -1.442695, %v2050_v3  ;;  %v2544_v17 = vpop.f32.mrb[28].mxu0 }
0x244e   :  { %2759 = vpow2.f32 %v2200_v5  ;;  %v2065_v9 = vadd.f32 %v2544_v17, %v3289_v22  ;;  %v2059_v10 = vpop.f32.mrb[29].mxu0 }
0x244f   :  { %v2060_v12 = vadd.f32 %v3289_v22, %v2059_v10  ;;  %2761 = vpow2.f32 %v2199_v7 }
0x2450   :  { %v2202_v14 = vmul.f32 -1.442695, %v2065_v9 }
0x2451   :  { %v2201_v23 = vmul.f32 -1.442695, %v2060_v12 }
0x2452   :  { %2763 = vpow2.f32 %v2202_v14 }
0x2453   :  { %2765 = vpow2.f32 %v2201_v23 }
0x2454   :  { %v2756_v24 = vpop.eup %2755 }
0x2455   :  { %v2758_v6 = vpop.eup %2757  ;;  %v2103_v25 = vadd.f32 1.0, %v2756_v24 }
0x2456   :  { %v2102_v26 = vadd.f32 1.0, %v2758_v6 }
0x2457   :  { %2767 = vrcp.f32 %v2103_v25 }
0x2458   :  { %v2760_v28 = vpop.eup %2759  ;;  %2769 = vrcp.f32 %v2102_v26 }
0x2459   :  { %v2105_v13 = vadd.f32 1.0, %v2760_v28  ;;  %v2762_v29 = vpop.eup %2761 }
0x245a   :  { %v2104_v30 = vadd.f32 1.0, %v2762_v29 }
0x245b   :  { %2771 = vrcp.f32 %v2105_v13 }
0x245c   :  { %v2764_v50 = vpop.eup %2763  ;;  %2773 = vrcp.f32 %v2104_v30 }
0x245d   :  { %v2766_v31 = vpop.eup %2765  ;;  %v2107_v16 = vadd.f32 1.0, %v2764_v50 }
0x245e   :  { %v2106_v33 = vadd.f32 1.0, %v2766_v31 }
0x245f   :  { %2775 = vrcp.f32 %v2107_v16 }
0x2460   :  { %2777 = vrcp.f32 %v2106_v33 }
0x2461   :  { %v2768_v34 = vpop.eup %2767  ;;  %2779 = vpow2.f32 %v2185_v15 }
0x2462   :  { %v2770_v35 = vpop.eup %2769  ;;  %2127 = vst.msk [vmem:[%s3354_s7 + $0x8] sm:$0xff] %vm202_vm2, %v2768_v34 }
0x2463   :  { %2126 = vst.msk [vmem:[%s3354_s7] sm:$0xff] %vm202_vm2, %v2770_v35 }
0x2465   :  { %v2772_v36 = vpop.eup %2771 }
0x2466   :  { %2129 = vst.msk [vmem:[%s3354_s7 + $0x18] sm:$0xff] %vm202_vm2, %v2772_v36  ;;  %v2774_v37 = vpop.eup %2773 }
0x2467   :  { %2128 = vst.msk [vmem:[%s3354_s7 + $0x10] sm:$0xff] %vm202_vm2, %v2774_v37 }
0x2469   :  { %v2776_v38 = vpop.eup %2775 }
0x246a   :  { %v2778_v39 = vpop.eup %2777  ;;  %2131 = vst.msk [vmem:[%s3354_s7 + $0x28] sm:$0xff] %vm202_vm2, %v2776_v38 }
0x246b   :  { %2130 = vst.msk [vmem:[%s3354_s7 + $0x20] sm:$0xff] %vm202_vm2, %v2778_v39  ;;  %v2780_v41 = vpop.eup %2779 }
0x246c   :  { %v1834_v8 = vadd.f32 1.0, %v2780_v41 }
0x246e   :  { %2781 = vrcp.f32 %v1834_v8 }
0x2478   :  { %v2782_v4 = vpop.eup %2781 }
0x2479   :  { %v1849_v32 = vsub.f32 1.0, %v2782_v4  ;;  %v1855_v47 = vmul.f32 %v2782_v4, %v3269_v18 }
0x24b2   :  { %v1840_v43 = vpop.permute.xlu0 %1839 }
0x24b3   :  { %v1842_v49 = vmul.f32 %v2782_v4, %v1840_v43 }
0x24b5   :  { %1844 = vrot.lane.b32.xlu1 %v1842_v49, %s2855_s4 }
0x2527   :  { %v1845_v44 = vpop.permute.xlu1 %1844 }
0x2528   :  { %v1847_v45 = vadd.f32 %v1845_v44, %v1136_v0 }
0x252a   :  { %2783 = vtanh.f32 %v1847_v45 }
0x2534   :  { %v2784_v46 = vpop.eup %2783 }
0x2535   :  { %1851 = vrot.lane.b32.xlu0 %v2784_v46, %s2852_s2 }
0x25a7   :  { %v1852_v48 = vpop.permute.xlu0 %1851 }
0x25a8   :  { %v1854_v51 = vmul.f32 %v1852_v48, %v1849_v32 }
0x25aa   :  { %v1856_v11 = vadd.f32 %v1855_v47, %v1854_v51 }
0x25ac   :  { %1858 = vrot.lane.b32.xlu1 %v1856_v11, %s2852_s2 }
0x261e   :  { %v1859_v52 = vpop.permute.xlu1 %1858 }
0x261f   :  { %2526 = vmatmul.mubr.msk.f32.vlgmr.msra.gmra.mrb[22].mxu1 %vm202_vm2, %v1859_v52  ;;  %2545 = vmatprep.mubr.msk.f32.mxu0 %vm202_vm2, %v1859_v52 }
0x26f2   :  { %v1928_v53 = vpop.f32.mrb[22].mxu1 }
0x26f3   :  { %v1939_v54 = vadd.f32 %v1928_v53, %v3167_v21  ;;  %v2527_v55 = vpop.f32.mrb[23].mxu1  ;;  %v1932_v57 = vadd.f32 %v1928_v53, %v1141_v56 }
0x26f5   :  { %1941 = vrot.lane.b32.xlu0 %v1939_v54, %s2855_s4  ;;  %v2187_v18 = vmul.f32 -1.442695, %v1932_v57 }
0x26f7   :  { %2785 = vpow2.f32 %v2187_v18 }
0x2701   :  { %v2786_v58 = vpop.eup %2785 }
0x2702   :  { %v1936_v27 = vadd.f32 1.0, %v2786_v58 }
0x2704   :  { %2787 = vrcp.f32 %v1936_v27 }
0x270e   :  { %v2788_v42 = vpop.eup %2787 }
0x270f   :  { %v1951_v2 = vsub.f32 1.0, %v2788_v42  ;;  %v1957_v20 = vmul.f32 %v2788_v42, %v1856_v11 }
0x2767   :  { %v1942_v59 = vpop.permute.xlu0 %1941 }
0x2768   :  { %v1944_v60 = vmul.f32 %v2788_v42, %v1942_v59 }
0x276a   :  { %1946 = vrot.lane.b32.xlu1 %v1944_v60, %s2855_s4 }
0x27dc   :  { %v1947_v61 = vpop.permute.xlu1 %1946 }
0x27dd   :  { %v1949_v62 = vadd.f32 %v1947_v61, %v1141_v56 }
0x27df   :  { %2789 = vtanh.f32 %v1949_v62 }
0x27e9   :  { %v2790_v21 = vpop.eup %2789 }
0x27ea   :  { %1953 = vrot.lane.b32.xlu0 %v2790_v21, %s2852_s2 }
0x285c   :  { %v1954_v63 = vpop.permute.xlu0 %1953 }
0x285d   :  { %v1956_v19 = vmul.f32 %v1954_v63, %v1951_v2 }
0x285f   :  { %v1958_v1 = vadd.f32 %v1957_v20, %v1956_v19 }
0x2861   :  { %1969 = vrot.lane.b32.xlu1 %v1958_v1, %s2852_s2 }
0x28d3   :  { %v1970_v3 = vpop.permute.xlu1 %1969 }
0x28d4   :  { %2546 = vmatmul.mubr.msk.f32.gmra.mrb[30].mxu0 %vm202_vm2, %v1970_v3 }
0x29a7   :  { %v2547_v5 = vpop.f32.mrb[30].mxu0 }
0x29a8   :  { %v2075_v7 = vadd.f32 %v2547_v5, %v3289_v22  ;;  %v2069_v17 = vpop.f32.mrb[31].mxu0 }
0x29a9   :  { %v2070_v9 = vadd.f32 %v3289_v22, %v2069_v17 }
0x29aa   :  { %v2204_v10 = vmul.f32 -1.442695, %v2075_v7 }
0x29ab   :  { %v2203_v12 = vmul.f32 -1.442695, %v2070_v9 }
0x29ac   :  { %2791 = vpow2.f32 %v2204_v10 }
0x29ad   :  { %2793 = vpow2.f32 %v2203_v12 }
0x29b6   :  { %v2792_v14 = vpop.eup %2791 }
0x29b7   :  { %v2794_v23 = vpop.eup %2793  ;;  %v2109_v24 = vadd.f32 1.0, %v2792_v14 }
0x29b8   :  { %v2108_v6 = vadd.f32 1.0, %v2794_v23 }
0x29b9   :  { %2795 = vrcp.f32 %v2109_v24 }
0x29ba   :  { %2797 = vrcp.f32 %v2108_v6 }
0x29c3   :  { %v2796_v25 = vpop.eup %2795 }
0x29c4   :  { %v2798_v26 = vpop.eup %2797  ;;  %2133 = vst.msk [vmem:[%s3354_s7 + $0x38] sm:$0xff] %vm202_vm2, %v2796_v25 }
0x29c5   :  { %2132 = vst.msk [vmem:[%s3354_s7 + $0x30] sm:$0xff] %vm202_vm2, %v2798_v26 }
0x29c6   :  { %2138 = vsyncpa [#allocation3], 1 }
0x29c7   :  { %2139 = vsyncpa [#allocation5], 1 }

</bundles_post_ra>
